<compile_context>
chip_gen: v7x
topology: tpu7x:2x2x1
jax: 0.10.0
libtpu: 0.0.40
codegen_flags: <defaults>
</compile_context>

<pallas_src>
import jax
import jax.numpy as jnp
from jax import lax
from jax.experimental import pallas as pl
from jax.experimental.pallas import tpu as pltpu


def _round_up(x, m):
    return ((x + m - 1) // m) * m


def _lstm_fc_kernel(x_ref, wih_ref, whh_ref, b_ref, wfc_ref, bfc_ref,
                    out_ref, pre_sc, h_sc, c_sc):
    """One (batch block, time chunk) grid step.

    x_ref   : (Tc*Bb, E)    flattened time-major chunk, row = t*Bb + j (matmul dtype)
    wih_ref : (E, 4Hp)      W_ih^T, gate-padded                        (matmul dtype)
    whh_ref : (Hp, 4Hp)     W_hh^T, gate-padded                        (matmul dtype)
    b_ref   : (1, 4Hp)      b_ih + b_hh, gate-padded                   (f32)
    wfc_ref : (Hp, Op)      W_fc^T, padded                             (matmul dtype)
    bfc_ref : (1, Op)       b_fc, padded                               (f32)
    out_ref : (Bb, Op)      padded logits (written on the last time chunk)
    pre_sc  : (Tc*Bb, 4Hp)  VMEM scratch: hoisted input projection for this chunk
    h_sc,c_sc: (Bb, Hp)     f32 LSTM state, carried across time chunks
    """
    rows = x_ref.shape[0]
    Bb, Hp = h_sc.shape
    t_chunk = rows // Bb
    tc = pl.program_id(1)
    mm_dtype = whh_ref.dtype

    @pl.when(tc == 0)
    def _():
        h_sc[...] = jnp.zeros_like(h_sc)
        c_sc[...] = jnp.zeros_like(c_sc)

    # ---- Phase 1: hoisted input projection for this chunk (one big MXU matmul).
    pre = jnp.dot(x_ref[...], wih_ref[...], preferred_element_type=jnp.float32)
    pre_sc[...] = (pre + b_ref[...]).astype(pre_sc.dtype)
    # TODO(synk): a 1-chunk software pipeline (project chunk k+1 while the recurrence
    # consumes chunk k's pre_sc) would fill the idle MXU slots during phase 2.

    def step(t, carry):
        h, c = carry
        r0 = pl.multiple_of(t * Bb, 8)                    # sublane-aligned slice start
        pre_t = pre_sc[pl.ds(r0, Bb), :].astype(jnp.float32)
        # W_hh is loaded inside the step (vld hides under the MXU push); no
        # loop-spanning vreg live range -> no spills on the serial chain.
        gates = pre_t + jnp.dot(h.astype(mm_dtype), whh_ref[...],
                                preferred_element_type=jnp.float32)
        # Hp is a multiple of 128 -> lane-aligned (free) gate views.
        # sigmoid(x) = 0.5*tanh(0.5*x) + 0.5 : a single EUP op per gate.
        i = 0.5 * jnp.tanh(0.5 * gates[:, 0 * Hp:1 * Hp]) + 0.5
        f = 0.5 * jnp.tanh(0.5 * gates[:, 1 * Hp:2 * Hp]) + 0.5
        g = jnp.tanh(gates[:, 2 * Hp:3 * Hp])
        o = 0.5 * jnp.tanh(0.5 * gates[:, 3 * Hp:4 * Hp]) + 0.5
        c_new = f * c + i * g
        h_new = o * jnp.tanh(c_new)
        return (h_new, c_new)

    # Bounded unroll: keeps LLO scheduling visibility without exploding the
    # instruction count / register pressure for long chunks.
    h, c = lax.fori_loop(0, t_chunk, step, (h_sc[...], c_sc[...]),
                         unroll=min(t_chunk, 8))
    h_sc[...] = h
    c_sc[...] = c

    # ---- Phase 3: fc(hidden[-1]) on the last chunk; lane-dense padded store.
    @pl.when(tc == pl.num_programs(1) - 1)
    def _():
        out_ref[...] = (jnp.dot(h.astype(wfc_ref.dtype), wfc_ref[...],
                                preferred_element_type=jnp.float32)
                        + bfc_ref[...]).astype(out_ref.dtype)


def lstm_classifier_forward(x_ids, params, *, matmul_dtype=jnp.bfloat16,
                            pre_dtype=None, batch_block=None, t_chunk=None):
    """x_ids: (B, T) int32 token ids. Returns logits (B, output_dim) float32.

    matmul_dtype: bf16 (default; MXU-native on v5e/v6e/v7x, halves weight/x VMEM
                  and DMA bytes) or f32 (bit-exact vs. the f32 reference).  f32
                  accumulation and f32 gate/state math are kept either way.
    pre_dtype   : storage dtype of the hoisted input projection (defaults to
                  matmul_dtype; halves the biggest VMEM consumer when bf16).
    batch_block : batch tile (multiple of 8, divides padded batch).  On v7x pass
                  Bp//2 explicitly (n_bblocks >= 2) so the "parallel" axis
                  occupies both TensorCores.
    t_chunk     : time-chunk length (divides T).  VMEM scales with t_chunk, not T.
    """
    emb = params["embedding"]                      # (V, E), row 0 zeroed (padding_idx=0)
    w_ih, w_hh = params["w_ih"], params["w_hh"]    # (4H, E), (4H, H)
    b_ih, b_hh = params["b_ih"], params["b_hh"]    # (4H,), (4H,)
    w_fc, b_fc = params["w_fc"], params["b_fc"]    # (O, H), (O,)

    B, T = x_ids.shape
    E = emb.shape[1]
    H = w_hh.shape[1]
    O = w_fc.shape[0]

    Hp = _round_up(H, 128)     # lane-aligned gate blocks
    Op = _round_up(O, 128)     # lane-dense logits store
    Bp = _round_up(B, 8)       # sublane-aligned batch

    if batch_block is None:
        # MXU M-dim utilisation: keep blocks <= 256 rows (full systolic height).
        batch_block = Bp
        if Bp > 256:
            for cand in range(256, 7, -8):
                if Bp % cand == 0:
                    batch_block = cand
                    break
    assert batch_block % 8 == 0 and Bp % batch_block == 0
    n_bblocks = Bp // batch_block

    if t_chunk is None:
        # Chunk the time axis so pre_sc / the resident x block scale with the
        # chunk length instead of T (v7x 64 MiB VMEM, v5e 16 MiB scoped default).
        t_chunk = T
        if T > 32:
            for cand in (32, 16, 8, 4, 2):
                if T % cand == 0:
                    t_chunk = cand
                    break
    assert T % t_chunk == 0
    n_tchunks = T // t_chunk

    if pre_dtype is None:
        pre_dtype = matmul_dtype

    # ---- glue (plain JAX): embedding lookup + padding / layout prep ----
    x_emb = jnp.take(emb, x_ids, axis=0).astype(jnp.float32)          # (B, T, E)
    x_emb = jnp.pad(x_emb, ((0, Bp - B), (0, 0), (0, 0)))             # (Bp, T, E)
    # Per batch block, flatten time-major: row index = t * batch_block + j.
    # (all reshapes/transposes happen here in XLA, not inside the kernel)
    x_flat = (x_emb.reshape(n_bblocks, batch_block, T, E)
                   .transpose(0, 2, 1, 3)
                   .reshape(n_bblocks, T * batch_block, E)
                   .astype(matmul_dtype))                             # (nb, T*Bb, E)

    def pad_gate_cols(w_t):    # (in, 4H) -> (in, 4Hp), zero-pad each gate block
        d = w_t.shape[0]
        return jnp.pad(w_t.reshape(d, 4, H),
                       ((0, 0), (0, 0), (0, Hp - H))).reshape(d, 4 * Hp)

    wih_t = pad_gate_cols(w_ih.T.astype(jnp.float32))                 # (E, 4Hp)
    whh_t = pad_gate_cols(w_hh.T.astype(jnp.float32))                 # (H, 4Hp)
    whh_t = jnp.pad(whh_t, ((0, Hp - H), (0, 0)))                     # (Hp, 4Hp)
    bias = jnp.pad((b_ih + b_hh).astype(jnp.float32).reshape(4, H),
                   ((0, 0), (0, Hp - H))).reshape(1, 4 * Hp)          # (1, 4Hp)
    wfc_t = jnp.pad(w_fc.T.astype(jnp.float32),
                    ((0, Hp - H), (0, Op - O)))                       # (Hp, Op)
    bfc = jnp.pad(b_fc.astype(jnp.float32), (0, Op - O)).reshape(1, Op)

    wih_t = wih_t.astype(matmul_dtype)
    whh_t = whh_t.astype(matmul_dtype)
    wfc_t = wfc_t.astype(matmul_dtype)

    # ---- explicit VMEM budget -> vmem_limit_bytes ----
    mm_bytes = jnp.dtype(matmul_dtype).itemsize
    pre_bytes = jnp.dtype(pre_dtype).itemsize
    vmem_est = (
        2 * t_chunk * batch_block * E * mm_bytes           # x chunk (double-buffered)
        + 2 * (E + Hp) * 4 * Hp * mm_bytes                 # W_ih^T + W_hh^T (2 pipeline bufs)
        + 2 * Hp * Op * mm_bytes                           # W_fc^T
        + 2 * (4 * Hp + Op) * 4                            # biases (f32)
        + t_chunk * batch_block * 4 * Hp * pre_bytes       # pre_sc scratch
        + 2 * batch_block * Hp * 4                         # h / c state scratch
        + 2 * batch_block * Op * 4                         # logits block
    )
    vmem_limit = min(128 << 20, max(2 * vmem_est + (4 << 20), 32 << 20))

    # NOTE: the grid-invariant weight specs keep the default 2-deep pipeline
    # buffers (pl.Buffered(1) support is version-dependent); at these sizes the
    # duplicate weight copy is a few hundred KiB and is covered by vmem_limit.
    grid_spec = pltpu.PrefetchScalarGridSpec(
        num_scalar_prefetch=0,
        grid=(n_bblocks, n_tchunks),                       # batch "parallel", time "arbitrary"
        in_specs=[
            pl.BlockSpec((None, t_chunk * batch_block, E),
                         lambda b, tc: (b, tc, 0)),        # streamed x chunk
            pl.BlockSpec((E, 4 * Hp), lambda b, tc: (0, 0)),    # W_ih^T (resident)
            pl.BlockSpec((Hp, 4 * Hp), lambda b, tc: (0, 0)),   # W_hh^T (resident)
            pl.BlockSpec((1, 4 * Hp), lambda b, tc: (0, 0)),    # combined bias
            pl.BlockSpec((Hp, Op), lambda b, tc: (0, 0)),       # W_fc^T
            pl.BlockSpec((1, Op), lambda b, tc: (0, 0)),        # b_fc
        ],
        out_specs=pl.BlockSpec((batch_block, Op), lambda b, tc: (b, 0)),
        scratch_shapes=[
            pltpu.VMEM((t_chunk * batch_block, 4 * Hp), pre_dtype),  # hoisted projection
            pltpu.VMEM((batch_block, Hp), jnp.float32),              # h state (chunk-carried)
            pltpu.VMEM((batch_block, Hp), jnp.float32),              # c state (chunk-carried)
        ],
    )

    out = pl.pallas_call(
        _lstm_fc_kernel,
        out_shape=jax.ShapeDtypeStruct((Bp, Op), jnp.float32),
        grid_spec=grid_spec,
        compiler_params=pltpu.CompilerParams(
            dimension_semantics=("parallel", "arbitrary"),
            vmem_limit_bytes=int(vmem_limit)),
    )(x_flat, wih_t, whh_t, bias, wfc_t, bfc)

    return out[:B, :O]


def _reference_forward(x_ids, params):
    """Pure-JAX reference matching PyTorch nn.LSTM (batch_first) semantics."""
    emb = params["embedding"]
    w_ih, w_hh = params["w_ih"], params["w_hh"]
    b_ih, b_hh = params["b_ih"], params["b_hh"]
    w_fc, b_fc = params["w_fc"], params["b_fc"]
    H = w_hh.shape[1]

    x = jnp.take(emb, x_ids, axis=0)               # (B, T, E)
    B = x.shape[0]
    h = jnp.zeros((B, H), jnp.float32)
    c = jnp.zeros((B, H), jnp.float32)

    def step(carry, x_t):
        h, c = carry
        gates = x_t @ w_ih.T + b_ih + h @ w_hh.T + b_hh
        i = jax.nn.sigmoid(gates[:, 0:H])
        f = jax.nn.sigmoid(gates[:, H:2 * H])
        g = jnp.tanh(gates[:, 2 * H:3 * H])
        o = jax.nn.sigmoid(gates[:, 3 * H:4 * H])
        c = f * c + i * g
        h = o * jnp.tanh(c)
        return (h, c), None

    (h, _), _ = jax.lax.scan(step, (h, c), jnp.transpose(x, (1, 0, 2)))
    return h @ w_fc.T + b_fc


def init_params(key, vocab_size, embedding_dim, hidden_dim, output_dim):
    ks = jax.random.split(key, 7)
    emb = jax.random.normal(ks[0], (vocab_size, embedding_dim), jnp.float32) * 0.1
    emb = emb.at[0].set(0.0)   # padding_idx=0 -> zero row
    scale = 1.0 / jnp.sqrt(hidden_dim)
    return {
        "embedding": emb,
        "w_ih": jax.random.uniform(ks[1], (4 * hidden_dim, embedding_dim),
                                   jnp.float32, -scale, scale),
        "w_hh": jax.random.uniform(ks[2], (4 * hidden_dim, hidden_dim),
                                   jnp.float32, -scale, scale),
        "b_ih": jax.random.uniform(ks[3], (4 * hidden_dim,),
                                   jnp.float32, -scale, scale),
        "b_hh": jax.random.uniform(ks[4], (4 * hidden_dim,),
                                   jnp.float32, -scale, scale),
        "w_fc": jax.random.uniform(ks[5], (output_dim, hidden_dim),
                                   jnp.float32, -scale, scale),
        "b_fc": jax.random.uniform(ks[6], (output_dim,),
                                   jnp.float32, -scale, scale),
    }


if __name__ == "__main__":
    vocab_size, embedding_dim, hidden_dim, output_dim = 50, 16, 32, 4
    batch, seq = 2, 8

    key = jax.random.PRNGKey(0)
    k_param, k_ids = jax.random.split(key)
    params = init_params(k_param, vocab_size, embedding_dim, hidden_dim, output_dim)
    x_ids = jax.random.randint(k_ids, (batch, seq), 0, vocab_size, jnp.int32)

    ref = jax.block_until_ready(_reference_forward(x_ids, params))

    # f32 matmul path, single time chunk (numerically matches the reference).
    out_f32 = jax.block_until_ready(
        lstm_classifier_forward(x_ids, params, matmul_dtype=jnp.float32))
    assert out_f32.shape == (batch, output_dim)
    assert jnp.allclose(out_f32, ref, atol=1e-4, rtol=1e-4), (out_f32, ref)

    # f32 path with the time-chunked grid (h/c carried across chunks in scratch).
    out_chunk = jax.block_until_ready(
        lstm_classifier_forward(x_ids, params, matmul_dtype=jnp.float32, t_chunk=4))
    assert jnp.allclose(out_chunk, ref, atol=1e-4, rtol=1e-4), (out_chunk, ref)

    # Default bf16 matmul-operand path (MXU fast path on v5e/v6e/v7x);
    # f32 accumulation / gate math / h,c state are kept.
    out_bf16 = jax.block_until_ready(lstm_classifier_forward(x_ids, params))
    assert out_bf16.shape == (batch, output_dim)
    assert jnp.allclose(out_bf16, ref, atol=5e-2, rtol=5e-2), (out_bf16, ref)

    print("KERNEL_OK")
</pallas_src>

<mosaic_0001>
module attributes {stable_mosaic.version = 11 : i64} {
  func.func @_lstm_fc_kernel(%arg0: i32, %arg1: i32, %arg2: memref<1x64x16xf32, #tpu.memory_space<vmem>>, %arg3: memref<16x512xf32, #tpu.memory_space<vmem>>, %arg4: memref<128x512xf32, #tpu.memory_space<vmem>>, %arg5: memref<1x512xf32, #tpu.memory_space<vmem>>, %arg6: memref<128x128xf32, #tpu.memory_space<vmem>>, %arg7: memref<1x128xf32, #tpu.memory_space<vmem>>, %arg8: memref<8x128xf32, #tpu.memory_space<vmem>>, %arg9: memref<64x512xf32, #tpu.memory_space<vmem>>, %arg10: memref<8x128xf32, #tpu.memory_space<vmem>>, %arg11: memref<8x128xf32, #tpu.memory_space<vmem>>) attributes {dimension_semantics = [#tpu.dimension_semantics<parallel>, #tpu.dimension_semantics<arbitrary>], iteration_bounds = array<i64: 1, 1>, scalar_prefetch = 0 : i64, scratch_operands = 3 : i64, tpu.core_type = #tpu.core_type<tc>, window_params = [{transform_indices = @transform_0, window_bounds = array<i64: 1, 64, 16>}, {pipeline_mode = #tpu.pipeline_mode<synchronous>, transform_indices = @transform_1, window_bounds = array<i64: 16, 512>}, {pipeline_mode = #tpu.pipeline_mode<synchronous>, transform_indices = @transform_2, window_bounds = array<i64: 128, 512>}, {pipeline_mode = #tpu.pipeline_mode<synchronous>, transform_indices = @transform_3, window_bounds = array<i64: 1, 512>}, {pipeline_mode = #tpu.pipeline_mode<synchronous>, transform_indices = @transform_4, window_bounds = array<i64: 128, 128>}, {pipeline_mode = #tpu.pipeline_mode<synchronous>, transform_indices = @transform_5, window_bounds = array<i64: 1, 128>}, {transform_indices = @transform_6, window_bounds = array<i64: 8, 128>}]} {
    %c0_i32 = arith.constant 0 : i32
    %0 = arith.cmpi eq, %arg1, %c0_i32 : i32
    %1 = arith.extui %0 : i1 to i32
    %c0_i32_0 = arith.constant 0 : i32
    %2 = arith.cmpi ne, %1, %c0_i32_0 : i32
    scf.if %2 {
      %cst_132 = arith.constant 0.000000e+00 : f32
      %322 = vector.broadcast %cst_132 : f32 to vector<8x128xf32>
      %c0_133 = arith.constant 0 : index
      %c0_134 = arith.constant 0 : index
      %323 = vector.load %arg10[%c0_133, %c0_134] : memref<8x128xf32, #tpu.memory_space<vmem>>, vector<8x128xf32>
      tpu.vector_store %arg10[%c0_133, %c0_134], %322 {strides = array<i32>} : memref<8x128xf32, #tpu.memory_space<vmem>>, vector<8x128xf32>,
      %cst_135 = arith.constant 0.000000e+00 : f32
      %324 = vector.broadcast %cst_135 : f32 to vector<8x128xf32>
      %c0_136 = arith.constant 0 : index
      %c0_137 = arith.constant 0 : index
      %325 = vector.load %arg11[%c0_136, %c0_137] : memref<8x128xf32, #tpu.memory_space<vmem>>, vector<8x128xf32>
      tpu.vector_store %arg11[%c0_136, %c0_137], %324 {strides = array<i32>} : memref<8x128xf32, #tpu.memory_space<vmem>>, vector<8x128xf32>,
    } else {
    }
    %c0 = arith.constant 0 : index
    %c0_1 = arith.constant 0 : index
    %c0_2 = arith.constant 0 : index
    %3 = vector.load %arg2[%c0, %c0_1, %c0_2] : memref<1x64x16xf32, #tpu.memory_space<vmem>>, vector<1x64x16xf32>
    %4 = vector.shape_cast %3 : vector<1x64x16xf32> to vector<64x16xf32>
    %c0_3 = arith.constant 0 : index
    %c0_4 = arith.constant 0 : index
    %5 = vector.load %arg3[%c0_3, %c0_4] : memref<16x512xf32, #tpu.memory_space<vmem>>, vector<16x512xf32>
    %cst = arith.constant dense<0.000000e+00> : vector<64x512xf32>
    %6 = tpu.matmul %4, %5, %cst {dimension_numbers = #tpu.dot_dimension_numbers<[1], [0], [0], [1], [0, 0, 1, 1], [], []>} : vector<64x16xf32>, vector<16x512xf32>, vector<64x512xf32> -> vector<64x512xf32>
    %c0_5 = arith.constant 0 : index
    %c0_6 = arith.constant 0 : index
    %7 = vector.load %arg5[%c0_5, %c0_6] : memref<1x512xf32, #tpu.memory_space<vmem>>, vector<1x512xf32>
    %8 = vector.broadcast %7 : vector<1x512xf32> to vector<64x512xf32>
    %9 = arith.addf %6, %8 : vector<64x512xf32>
    %c0_7 = arith.constant 0 : index
    %c0_8 = arith.constant 0 : index
    %10 = vector.load %arg9[%c0_7, %c0_8] : memref<64x512xf32, #tpu.memory_space<vmem>>, vector<64x512xf32>
    tpu.vector_store %arg9[%c0_7, %c0_8], %9 {strides = array<i32>} : memref<64x512xf32, #tpu.memory_space<vmem>>, vector<64x512xf32>,
    %c0_9 = arith.constant 0 : index
    %c0_10 = arith.constant 0 : index
    %11 = vector.load %arg10[%c0_9, %c0_10] : memref<8x128xf32, #tpu.memory_space<vmem>>, vector<8x128xf32>
    %c0_11 = arith.constant 0 : index
    %c0_12 = arith.constant 0 : index
    %12 = vector.load %arg11[%c0_11, %c0_12] : memref<8x128xf32, #tpu.memory_space<vmem>>, vector<8x128xf32>
    %c0_i32_13 = arith.constant 0 : i32
    %c8_i32 = arith.constant 8 : i32
    %13 = arith.muli %c0_i32_13, %c8_i32 : i32
    %14 = tpu.assume_multiple %13, 8 : i32
    %15 = arith.index_cast %14 : i32 to index
    %c0_14 = arith.constant 0 : index
    %16 = vector.load %arg9[%15, %c0_14] : memref<64x512xf32, #tpu.memory_space<vmem>>, vector<8x512xf32>
    %c0_15 = arith.constant 0 : index
    %c0_16 = arith.constant 0 : index
    %17 = vector.load %arg4[%c0_15, %c0_16] : memref<128x512xf32, #tpu.memory_space<vmem>>, vector<128x512xf32>
    %cst_17 = arith.constant dense<0.000000e+00> : vector<8x512xf32>
    %18 = tpu.matmul %11, %17, %cst_17 {dimension_numbers = #tpu.dot_dimension_numbers<[1], [0], [0], [1], [0, 0, 1, 1], [], []>} : vector<8x128xf32>, vector<128x512xf32>, vector<8x512xf32> -> vector<8x512xf32>
    %19 = arith.addf %16, %18 : vector<8x512xf32>
    %20 = vector.extract_strided_slice %19 {offsets = [0, 0], sizes = [8, 128], strides = [1, 1]} : vector<8x512xf32> to vector<8x128xf32>
    %cst_18 = arith.constant 5.000000e-01 : f32
    %21 = vector.broadcast %cst_18 : f32 to vector<8x128xf32>
    %22 = arith.mulf %21, %20 : vector<8x128xf32>
    %23 = math.tanh %22 : vector<8x128xf32>
    %cst_19 = arith.constant 5.000000e-01 : f32
    %24 = vector.broadcast %cst_19 : f32 to vector<8x128xf32>
    %25 = arith.mulf %24, %23 : vector<8x128xf32>
    %cst_20 = arith.constant 5.000000e-01 : f32
    %26 = vector.broadcast %cst_20 : f32 to vector<8x128xf32>
    %27 = arith.addf %25, %26 : vector<8x128xf32>
    %28 = vector.extract_strided_slice %19 {offsets = [0, 128], sizes = [8, 128], strides = [1, 1]} : vector<8x512xf32> to vector<8x128xf32>
    %cst_21 = arith.constant 5.000000e-01 : f32
    %29 = vector.broadcast %cst_21 : f32 to vector<8x128xf32>
    %30 = arith.mulf %29, %28 : vector<8x128xf32>
    %31 = math.tanh %30 : vector<8x128xf32>
    %cst_22 = arith.constant 5.000000e-01 : f32
    %32 = vector.broadcast %cst_22 : f32 to vector<8x128xf32>
    %33 = arith.mulf %32, %31 : vector<8x128xf32>
    %cst_23 = arith.constant 5.000000e-01 : f32
    %34 = vector.broadcast %cst_23 : f32 to vector<8x128xf32>
    %35 = arith.addf %33, %34 : vector<8x128xf32>
    %36 = vector.extract_strided_slice %19 {offsets = [0, 256], sizes = [8, 128], strides = [1, 1]} : vector<8x512xf32> to vector<8x128xf32>
    %37 = math.tanh %36 : vector<8x128xf32>
    %38 = vector.extract_strided_slice %19 {offsets = [0, 384], sizes = [8, 128], strides = [1, 1]} : vector<8x512xf32> to vector<8x128xf32>
    %cst_24 = arith.constant 5.000000e-01 : f32
    %39 = vector.broadcast %cst_24 : f32 to vector<8x128xf32>
    %40 = arith.mulf %39, %38 : vector<8x128xf32>
    %41 = math.tanh %40 : vector<8x128xf32>
    %cst_25 = arith.constant 5.000000e-01 : f32
    %42 = vector.broadcast %cst_25 : f32 to vector<8x128xf32>
    %43 = arith.mulf %42, %41 : vector<8x128xf32>
    %cst_26 = arith.constant 5.000000e-01 : f32
    %44 = vector.broadcast %cst_26 : f32 to vector<8x128xf32>
    %45 = arith.addf %43, %44 : vector<8x128xf32>
    %46 = arith.mulf %35, %12 : vector<8x128xf32>
    %47 = arith.mulf %27, %37 : vector<8x128xf32>
    %48 = arith.addf %46, %47 : vector<8x128xf32>
    %49 = math.tanh %48 : vector<8x128xf32>
    %50 = arith.mulf %45, %49 : vector<8x128xf32>
    %c1_i32 = arith.constant 1 : i32
    %c8_i32_27 = arith.constant 8 : i32
    %51 = arith.muli %c1_i32, %c8_i32_27 : i32
    %52 = tpu.assume_multiple %51, 8 : i32
    %53 = arith.index_cast %52 : i32 to index
    %c0_28 = arith.constant 0 : index
    %54 = vector.load %arg9[%53, %c0_28] : memref<64x512xf32, #tpu.memory_space<vmem>>, vector<8x512xf32>
    %c0_29 = arith.constant 0 : index
    %c0_30 = arith.constant 0 : index
    %55 = vector.load %arg4[%c0_29, %c0_30] : memref<128x512xf32, #tpu.memory_space<vmem>>, vector<128x512xf32>
    %cst_31 = arith.constant dense<0.000000e+00> : vector<8x512xf32>
    %56 = tpu.matmul %50, %55, %cst_31 {dimension_numbers = #tpu.dot_dimension_numbers<[1], [0], [0], [1], [0, 0, 1, 1], [], []>} : vector<8x128xf32>, vector<128x512xf32>, vector<8x512xf32> -> vector<8x512xf32>
    %57 = arith.addf %54, %56 : vector<8x512xf32>
    %58 = vector.extract_strided_slice %57 {offsets = [0, 0], sizes = [8, 128], strides = [1, 1]} : vector<8x512xf32> to vector<8x128xf32>
    %cst_32 = arith.constant 5.000000e-01 : f32
    %59 = vector.broadcast %cst_32 : f32 to vector<8x128xf32>
    %60 = arith.mulf %59, %58 : vector<8x128xf32>
    %61 = math.tanh %60 : vector<8x128xf32>
    %cst_33 = arith.constant 5.000000e-01 : f32
    %62 = vector.broadcast %cst_33 : f32 to vector<8x128xf32>
    %63 = arith.mulf %62, %61 : vector<8x128xf32>
    %cst_34 = arith.constant 5.000000e-01 : f32
    %64 = vector.broadcast %cst_34 : f32 to vector<8x128xf32>
    %65 = arith.addf %63, %64 : vector<8x128xf32>
    %66 = vector.extract_strided_slice %57 {offsets = [0, 128], sizes = [8, 128], strides = [1, 1]} : vector<8x512xf32> to vector<8x128xf32>
    %cst_35 = arith.constant 5.000000e-01 : f32
    %67 = vector.broadcast %cst_35 : f32 to vector<8x128xf32>
    %68 = arith.mulf %67, %66 : vector<8x128xf32>
    %69 = math.tanh %68 : vector<8x128xf32>
    %cst_36 = arith.constant 5.000000e-01 : f32
    %70 = vector.broadcast %cst_36 : f32 to vector<8x128xf32>
    %71 = arith.mulf %70, %69 : vector<8x128xf32>
    %cst_37 = arith.constant 5.000000e-01 : f32
    %72 = vector.broadcast %cst_37 : f32 to vector<8x128xf32>
    %73 = arith.addf %71, %72 : vector<8x128xf32>
    %74 = vector.extract_strided_slice %57 {offsets = [0, 256], sizes = [8, 128], strides = [1, 1]} : vector<8x512xf32> to vector<8x128xf32>
    %75 = math.tanh %74 : vector<8x128xf32>
    %76 = vector.extract_strided_slice %57 {offsets = [0, 384], sizes = [8, 128], strides = [1, 1]} : vector<8x512xf32> to vector<8x128xf32>
    %cst_38 = arith.constant 5.000000e-01 : f32
    %77 = vector.broadcast %cst_38 : f32 to vector<8x128xf32>
    %78 = arith.mulf %77, %76 : vector<8x128xf32>
    %79 = math.tanh %78 : vector<8x128xf32>
    %cst_39 = arith.constant 5.000000e-01 : f32
    %80 = vector.broadcast %cst_39 : f32 to vector<8x128xf32>
    %81 = arith.mulf %80, %79 : vector<8x128xf32>
    %cst_40 = arith.constant 5.000000e-01 : f32
    %82 = vector.broadcast %cst_40 : f32 to vector<8x128xf32>
    %83 = arith.addf %81, %82 : vector<8x128xf32>
    %84 = arith.mulf %73, %48 : vector<8x128xf32>
    %85 = arith.mulf %65, %75 : vector<8x128xf32>
    %86 = arith.addf %84, %85 : vector<8x128xf32>
    %87 = math.tanh %86 : vector<8x128xf32>
    %88 = arith.mulf %83, %87 : vector<8x128xf32>
    %c2_i32 = arith.constant 2 : i32
    %c8_i32_41 = arith.constant 8 : i32
    %89 = arith.muli %c2_i32, %c8_i32_41 : i32
    %90 = tpu.assume_multiple %89, 8 : i32
    %91 = arith.index_cast %90 : i32 to index
    %c0_42 = arith.constant 0 : index
    %92 = vector.load %arg9[%91, %c0_42] : memref<64x512xf32, #tpu.memory_space<vmem>>, vector<8x512xf32>
    %c0_43 = arith.constant 0 : index
    %c0_44 = arith.constant 0 : index
    %93 = vector.load %arg4[%c0_43, %c0_44] : memref<128x512xf32, #tpu.memory_space<vmem>>, vector<128x512xf32>
    %cst_45 = arith.constant dense<0.000000e+00> : vector<8x512xf32>
    %94 = tpu.matmul %88, %93, %cst_45 {dimension_numbers = #tpu.dot_dimension_numbers<[1], [0], [0], [1], [0, 0, 1, 1], [], []>} : vector<8x128xf32>, vector<128x512xf32>, vector<8x512xf32> -> vector<8x512xf32>
    %95 = arith.addf %92, %94 : vector<8x512xf32>
    %96 = vector.extract_strided_slice %95 {offsets = [0, 0], sizes = [8, 128], strides = [1, 1]} : vector<8x512xf32> to vector<8x128xf32>
    %cst_46 = arith.constant 5.000000e-01 : f32
    %97 = vector.broadcast %cst_46 : f32 to vector<8x128xf32>
    %98 = arith.mulf %97, %96 : vector<8x128xf32>
    %99 = math.tanh %98 : vector<8x128xf32>
    %cst_47 = arith.constant 5.000000e-01 : f32
    %100 = vector.broadcast %cst_47 : f32 to vector<8x128xf32>
    %101 = arith.mulf %100, %99 : vector<8x128xf32>
    %cst_48 = arith.constant 5.000000e-01 : f32
    %102 = vector.broadcast %cst_48 : f32 to vector<8x128xf32>
    %103 = arith.addf %101, %102 : vector<8x128xf32>
    %104 = vector.extract_strided_slice %95 {offsets = [0, 128], sizes = [8, 128], strides = [1, 1]} : vector<8x512xf32> to vector<8x128xf32>
    %cst_49 = arith.constant 5.000000e-01 : f32
    %105 = vector.broadcast %cst_49 : f32 to vector<8x128xf32>
    %106 = arith.mulf %105, %104 : vector<8x128xf32>
    %107 = math.tanh %106 : vector<8x128xf32>
    %cst_50 = arith.constant 5.000000e-01 : f32
    %108 = vector.broadcast %cst_50 : f32 to vector<8x128xf32>
    %109 = arith.mulf %108, %107 : vector<8x128xf32>
    %cst_51 = arith.constant 5.000000e-01 : f32
    %110 = vector.broadcast %cst_51 : f32 to vector<8x128xf32>
    %111 = arith.addf %109, %110 : vector<8x128xf32>
    %112 = vector.extract_strided_slice %95 {offsets = [0, 256], sizes = [8, 128], strides = [1, 1]} : vector<8x512xf32> to vector<8x128xf32>
    %113 = math.tanh %112 : vector<8x128xf32>
    %114 = vector.extract_strided_slice %95 {offsets = [0, 384], sizes = [8, 128], strides = [1, 1]} : vector<8x512xf32> to vector<8x128xf32>
    %cst_52 = arith.constant 5.000000e-01 : f32
    %115 = vector.broadcast %cst_52 : f32 to vector<8x128xf32>
    %116 = arith.mulf %115, %114 : vector<8x128xf32>
    %117 = math.tanh %116 : vector<8x128xf32>
    %cst_53 = arith.constant 5.000000e-01 : f32
    %118 = vector.broadcast %cst_53 : f32 to vector<8x128xf32>
    %119 = arith.mulf %118, %117 : vector<8x128xf32>
    %cst_54 = arith.constant 5.000000e-01 : f32
    %120 = vector.broadcast %cst_54 : f32 to vector<8x128xf32>
    %121 = arith.addf %119, %120 : vector<8x128xf32>
    %122 = arith.mulf %111, %86 : vector<8x128xf32>
    %123 = arith.mulf %103, %113 : vector<8x128xf32>
    %124 = arith.addf %122, %123 : vector<8x128xf32>
    %125 = math.tanh %124 : vector<8x128xf32>
    %126 = arith.mulf %121, %125 : vector<8x128xf32>
    %c3_i32 = arith.constant 3 : i32
    %c8_i32_55 = arith.constant 8 : i32
    %127 = arith.muli %c3_i32, %c8_i32_55 : i32
    %128 = tpu.assume_multiple %127, 8 : i32
    %129 = arith.index_cast %128 : i32 to index
    %c0_56 = arith.constant 0 : index
    %130 = vector.load %arg9[%129, %c0_56] : memref<64x512xf32, #tpu.memory_space<vmem>>, vector<8x512xf32>
    %c0_57 = arith.constant 0 : index
    %c0_58 = arith.constant 0 : index
    %131 = vector.load %arg4[%c0_57, %c0_58] : memref<128x512xf32, #tpu.memory_space<vmem>>, vector<128x512xf32>
    %cst_59 = arith.constant dense<0.000000e+00> : vector<8x512xf32>
    %132 = tpu.matmul %126, %131, %cst_59 {dimension_numbers = #tpu.dot_dimension_numbers<[1], [0], [0], [1], [0, 0, 1, 1], [], []>} : vector<8x128xf32>, vector<128x512xf32>, vector<8x512xf32> -> vector<8x512xf32>
    %133 = arith.addf %130, %132 : vector<8x512xf32>
    %134 = vector.extract_strided_slice %133 {offsets = [0, 0], sizes = [8, 128], strides = [1, 1]} : vector<8x512xf32> to vector<8x128xf32>
    %cst_60 = arith.constant 5.000000e-01 : f32
    %135 = vector.broadcast %cst_60 : f32 to vector<8x128xf32>
    %136 = arith.mulf %135, %134 : vector<8x128xf32>
    %137 = math.tanh %136 : vector<8x128xf32>
    %cst_61 = arith.constant 5.000000e-01 : f32
    %138 = vector.broadcast %cst_61 : f32 to vector<8x128xf32>
    %139 = arith.mulf %138, %137 : vector<8x128xf32>
    %cst_62 = arith.constant 5.000000e-01 : f32
    %140 = vector.broadcast %cst_62 : f32 to vector<8x128xf32>
    %141 = arith.addf %139, %140 : vector<8x128xf32>
    %142 = vector.extract_strided_slice %133 {offsets = [0, 128], sizes = [8, 128], strides = [1, 1]} : vector<8x512xf32> to vector<8x128xf32>
    %cst_63 = arith.constant 5.000000e-01 : f32
    %143 = vector.broadcast %cst_63 : f32 to vector<8x128xf32>
    %144 = arith.mulf %143, %142 : vector<8x128xf32>
    %145 = math.tanh %144 : vector<8x128xf32>
    %cst_64 = arith.constant 5.000000e-01 : f32
    %146 = vector.broadcast %cst_64 : f32 to vector<8x128xf32>
    %147 = arith.mulf %146, %145 : vector<8x128xf32>
    %cst_65 = arith.constant 5.000000e-01 : f32
    %148 = vector.broadcast %cst_65 : f32 to vector<8x128xf32>
    %149 = arith.addf %147, %148 : vector<8x128xf32>
    %150 = vector.extract_strided_slice %133 {offsets = [0, 256], sizes = [8, 128], strides = [1, 1]} : vector<8x512xf32> to vector<8x128xf32>
    %151 = math.tanh %150 : vector<8x128xf32>
    %152 = vector.extract_strided_slice %133 {offsets = [0, 384], sizes = [8, 128], strides = [1, 1]} : vector<8x512xf32> to vector<8x128xf32>
    %cst_66 = arith.constant 5.000000e-01 : f32
    %153 = vector.broadcast %cst_66 : f32 to vector<8x128xf32>
    %154 = arith.mulf %153, %152 : vector<8x128xf32>
    %155 = math.tanh %154 : vector<8x128xf32>
    %cst_67 = arith.constant 5.000000e-01 : f32
    %156 = vector.broadcast %cst_67 : f32 to vector<8x128xf32>
    %157 = arith.mulf %156, %155 : vector<8x128xf32>
    %cst_68 = arith.constant 5.000000e-01 : f32
    %158 = vector.broadcast %cst_68 : f32 to vector<8x128xf32>
    %159 = arith.addf %157, %158 : vector<8x128xf32>
    %160 = arith.mulf %149, %124 : vector<8x128xf32>
    %161 = arith.mulf %141, %151 : vector<8x128xf32>
    %162 = arith.addf %160, %161 : vector<8x128xf32>
    %163 = math.tanh %162 : vector<8x128xf32>
    %164 = arith.mulf %159, %163 : vector<8x128xf32>
    %c4_i32 = arith.constant 4 : i32
    %c8_i32_69 = arith.constant 8 : i32
    %165 = arith.muli %c4_i32, %c8_i32_69 : i32
    %166 = tpu.assume_multiple %165, 8 : i32
    %167 = arith.index_cast %166 : i32 to index
    %c0_70 = arith.constant 0 : index
    %168 = vector.load %arg9[%167, %c0_70] : memref<64x512xf32, #tpu.memory_space<vmem>>, vector<8x512xf32>
    %c0_71 = arith.constant 0 : index
    %c0_72 = arith.constant 0 : index
    %169 = vector.load %arg4[%c0_71, %c0_72] : memref<128x512xf32, #tpu.memory_space<vmem>>, vector<128x512xf32>
    %cst_73 = arith.constant dense<0.000000e+00> : vector<8x512xf32>
    %170 = tpu.matmul %164, %169, %cst_73 {dimension_numbers = #tpu.dot_dimension_numbers<[1], [0], [0], [1], [0, 0, 1, 1], [], []>} : vector<8x128xf32>, vector<128x512xf32>, vector<8x512xf32> -> vector<8x512xf32>
    %171 = arith.addf %168, %170 : vector<8x512xf32>
    %172 = vector.extract_strided_slice %171 {offsets = [0, 0], sizes = [8, 128], strides = [1, 1]} : vector<8x512xf32> to vector<8x128xf32>
    %cst_74 = arith.constant 5.000000e-01 : f32
    %173 = vector.broadcast %cst_74 : f32 to vector<8x128xf32>
    %174 = arith.mulf %173, %172 : vector<8x128xf32>
    %175 = math.tanh %174 : vector<8x128xf32>
    %cst_75 = arith.constant 5.000000e-01 : f32
    %176 = vector.broadcast %cst_75 : f32 to vector<8x128xf32>
    %177 = arith.mulf %176, %175 : vector<8x128xf32>
    %cst_76 = arith.constant 5.000000e-01 : f32
    %178 = vector.broadcast %cst_76 : f32 to vector<8x128xf32>
    %179 = arith.addf %177, %178 : vector<8x128xf32>
    %180 = vector.extract_strided_slice %171 {offsets = [0, 128], sizes = [8, 128], strides = [1, 1]} : vector<8x512xf32> to vector<8x128xf32>
    %cst_77 = arith.constant 5.000000e-01 : f32
    %181 = vector.broadcast %cst_77 : f32 to vector<8x128xf32>
    %182 = arith.mulf %181, %180 : vector<8x128xf32>
    %183 = math.tanh %182 : vector<8x128xf32>
    %cst_78 = arith.constant 5.000000e-01 : f32
    %184 = vector.broadcast %cst_78 : f32 to vector<8x128xf32>
    %185 = arith.mulf %184, %183 : vector<8x128xf32>
    %cst_79 = arith.constant 5.000000e-01 : f32
    %186 = vector.broadcast %cst_79 : f32 to vector<8x128xf32>
    %187 = arith.addf %185, %186 : vector<8x128xf32>
    %188 = vector.extract_strided_slice %171 {offsets = [0, 256], sizes = [8, 128], strides = [1, 1]} : vector<8x512xf32> to vector<8x128xf32>
    %189 = math.tanh %188 : vector<8x128xf32>
    %190 = vector.extract_strided_slice %171 {offsets = [0, 384], sizes = [8, 128], strides = [1, 1]} : vector<8x512xf32> to vector<8x128xf32>
    %cst_80 = arith.constant 5.000000e-01 : f32
    %191 = vector.broadcast %cst_80 : f32 to vector<8x128xf32>
    %192 = arith.mulf %191, %190 : vector<8x128xf32>
    %193 = math.tanh %192 : vector<8x128xf32>
    %cst_81 = arith.constant 5.000000e-01 : f32
    %194 = vector.broadcast %cst_81 : f32 to vector<8x128xf32>
    %195 = arith.mulf %194, %193 : vector<8x128xf32>
    %cst_82 = arith.constant 5.000000e-01 : f32
    %196 = vector.broadcast %cst_82 : f32 to vector<8x128xf32>
    %197 = arith.addf %195, %196 : vector<8x128xf32>
    %198 = arith.mulf %187, %162 : vector<8x128xf32>
    %199 = arith.mulf %179, %189 : vector<8x128xf32>
    %200 = arith.addf %198, %199 : vector<8x128xf32>
    %201 = math.tanh %200 : vector<8x128xf32>
    %202 = arith.mulf %197, %201 : vector<8x128xf32>
    %c5_i32 = arith.constant 5 : i32
    %c8_i32_83 = arith.constant 8 : i32
    %203 = arith.muli %c5_i32, %c8_i32_83 : i32
    %204 = tpu.assume_multiple %203, 8 : i32
    %205 = arith.index_cast %204 : i32 to index
    %c0_84 = arith.constant 0 : index
    %206 = vector.load %arg9[%205, %c0_84] : memref<64x512xf32, #tpu.memory_space<vmem>>, vector<8x512xf32>
    %c0_85 = arith.constant 0 : index
    %c0_86 = arith.constant 0 : index
    %207 = vector.load %arg4[%c0_85, %c0_86] : memref<128x512xf32, #tpu.memory_space<vmem>>, vector<128x512xf32>
    %cst_87 = arith.constant dense<0.000000e+00> : vector<8x512xf32>
    %208 = tpu.matmul %202, %207, %cst_87 {dimension_numbers = #tpu.dot_dimension_numbers<[1], [0], [0], [1], [0, 0, 1, 1], [], []>} : vector<8x128xf32>, vector<128x512xf32>, vector<8x512xf32> -> vector<8x512xf32>
    %209 = arith.addf %206, %208 : vector<8x512xf32>
    %210 = vector.extract_strided_slice %209 {offsets = [0, 0], sizes = [8, 128], strides = [1, 1]} : vector<8x512xf32> to vector<8x128xf32>
    %cst_88 = arith.constant 5.000000e-01 : f32
    %211 = vector.broadcast %cst_88 : f32 to vector<8x128xf32>
    %212 = arith.mulf %211, %210 : vector<8x128xf32>
    %213 = math.tanh %212 : vector<8x128xf32>
    %cst_89 = arith.constant 5.000000e-01 : f32
    %214 = vector.broadcast %cst_89 : f32 to vector<8x128xf32>
    %215 = arith.mulf %214, %213 : vector<8x128xf32>
    %cst_90 = arith.constant 5.000000e-01 : f32
    %216 = vector.broadcast %cst_90 : f32 to vector<8x128xf32>
    %217 = arith.addf %215, %216 : vector<8x128xf32>
    %218 = vector.extract_strided_slice %209 {offsets = [0, 128], sizes = [8, 128], strides = [1, 1]} : vector<8x512xf32> to vector<8x128xf32>
    %cst_91 = arith.constant 5.000000e-01 : f32
    %219 = vector.broadcast %cst_91 : f32 to vector<8x128xf32>
    %220 = arith.mulf %219, %218 : vector<8x128xf32>
    %221 = math.tanh %220 : vector<8x128xf32>
    %cst_92 = arith.constant 5.000000e-01 : f32
    %222 = vector.broadcast %cst_92 : f32 to vector<8x128xf32>
    %223 = arith.mulf %222, %221 : vector<8x128xf32>
    %cst_93 = arith.constant 5.000000e-01 : f32
    %224 = vector.broadcast %cst_93 : f32 to vector<8x128xf32>
    %225 = arith.addf %223, %224 : vector<8x128xf32>
    %226 = vector.extract_strided_slice %209 {offsets = [0, 256], sizes = [8, 128], strides = [1, 1]} : vector<8x512xf32> to vector<8x128xf32>
    %227 = math.tanh %226 : vector<8x128xf32>
    %228 = vector.extract_strided_slice %209 {offsets = [0, 384], sizes = [8, 128], strides = [1, 1]} : vector<8x512xf32> to vector<8x128xf32>
    %cst_94 = arith.constant 5.000000e-01 : f32
    %229 = vector.broadcast %cst_94 : f32 to vector<8x128xf32>
    %230 = arith.mulf %229, %228 : vector<8x128xf32>
    %231 = math.tanh %230 : vector<8x128xf32>
    %cst_95 = arith.constant 5.000000e-01 : f32
    %232 = vector.broadcast %cst_95 : f32 to vector<8x128xf32>
    %233 = arith.mulf %232, %231 : vector<8x128xf32>
    %cst_96 = arith.constant 5.000000e-01 : f32
    %234 = vector.broadcast %cst_96 : f32 to vector<8x128xf32>
    %235 = arith.addf %233, %234 : vector<8x128xf32>
    %236 = arith.mulf %225, %200 : vector<8x128xf32>
    %237 = arith.mulf %217, %227 : vector<8x128xf32>
    %238 = arith.addf %236, %237 : vector<8x128xf32>
    %239 = math.tanh %238 : vector<8x128xf32>
    %240 = arith.mulf %235, %239 : vector<8x128xf32>
    %c6_i32 = arith.constant 6 : i32
    %c8_i32_97 = arith.constant 8 : i32
    %241 = arith.muli %c6_i32, %c8_i32_97 : i32
    %242 = tpu.assume_multiple %241, 8 : i32
    %243 = arith.index_cast %242 : i32 to index
    %c0_98 = arith.constant 0 : index
    %244 = vector.load %arg9[%243, %c0_98] : memref<64x512xf32, #tpu.memory_space<vmem>>, vector<8x512xf32>
    %c0_99 = arith.constant 0 : index
    %c0_100 = arith.constant 0 : index
    %245 = vector.load %arg4[%c0_99, %c0_100] : memref<128x512xf32, #tpu.memory_space<vmem>>, vector<128x512xf32>
    %cst_101 = arith.constant dense<0.000000e+00> : vector<8x512xf32>
    %246 = tpu.matmul %240, %245, %cst_101 {dimension_numbers = #tpu.dot_dimension_numbers<[1], [0], [0], [1], [0, 0, 1, 1], [], []>} : vector<8x128xf32>, vector<128x512xf32>, vector<8x512xf32> -> vector<8x512xf32>
    %247 = arith.addf %244, %246 : vector<8x512xf32>
    %248 = vector.extract_strided_slice %247 {offsets = [0, 0], sizes = [8, 128], strides = [1, 1]} : vector<8x512xf32> to vector<8x128xf32>
    %cst_102 = arith.constant 5.000000e-01 : f32
    %249 = vector.broadcast %cst_102 : f32 to vector<8x128xf32>
    %250 = arith.mulf %249, %248 : vector<8x128xf32>
    %251 = math.tanh %250 : vector<8x128xf32>
    %cst_103 = arith.constant 5.000000e-01 : f32
    %252 = vector.broadcast %cst_103 : f32 to vector<8x128xf32>
    %253 = arith.mulf %252, %251 : vector<8x128xf32>
    %cst_104 = arith.constant 5.000000e-01 : f32
    %254 = vector.broadcast %cst_104 : f32 to vector<8x128xf32>
    %255 = arith.addf %253, %254 : vector<8x128xf32>
    %256 = vector.extract_strided_slice %247 {offsets = [0, 128], sizes = [8, 128], strides = [1, 1]} : vector<8x512xf32> to vector<8x128xf32>
    %cst_105 = arith.constant 5.000000e-01 : f32
    %257 = vector.broadcast %cst_105 : f32 to vector<8x128xf32>
    %258 = arith.mulf %257, %256 : vector<8x128xf32>
    %259 = math.tanh %258 : vector<8x128xf32>
    %cst_106 = arith.constant 5.000000e-01 : f32
    %260 = vector.broadcast %cst_106 : f32 to vector<8x128xf32>
    %261 = arith.mulf %260, %259 : vector<8x128xf32>
    %cst_107 = arith.constant 5.000000e-01 : f32
    %262 = vector.broadcast %cst_107 : f32 to vector<8x128xf32>
    %263 = arith.addf %261, %262 : vector<8x128xf32>
    %264 = vector.extract_strided_slice %247 {offsets = [0, 256], sizes = [8, 128], strides = [1, 1]} : vector<8x512xf32> to vector<8x128xf32>
    %265 = math.tanh %264 : vector<8x128xf32>
    %266 = vector.extract_strided_slice %247 {offsets = [0, 384], sizes = [8, 128], strides = [1, 1]} : vector<8x512xf32> to vector<8x128xf32>
    %cst_108 = arith.constant 5.000000e-01 : f32
    %267 = vector.broadcast %cst_108 : f32 to vector<8x128xf32>
    %268 = arith.mulf %267, %266 : vector<8x128xf32>
    %269 = math.tanh %268 : vector<8x128xf32>
    %cst_109 = arith.constant 5.000000e-01 : f32
    %270 = vector.broadcast %cst_109 : f32 to vector<8x128xf32>
    %271 = arith.mulf %270, %269 : vector<8x128xf32>
    %cst_110 = arith.constant 5.000000e-01 : f32
    %272 = vector.broadcast %cst_110 : f32 to vector<8x128xf32>
    %273 = arith.addf %271, %272 : vector<8x128xf32>
    %274 = arith.mulf %263, %238 : vector<8x128xf32>
    %275 = arith.mulf %255, %265 : vector<8x128xf32>
    %276 = arith.addf %274, %275 : vector<8x128xf32>
    %277 = math.tanh %276 : vector<8x128xf32>
    %278 = arith.mulf %273, %277 : vector<8x128xf32>
    %c7_i32 = arith.constant 7 : i32
    %c8_i32_111 = arith.constant 8 : i32
    %279 = arith.muli %c7_i32, %c8_i32_111 : i32
    %280 = tpu.assume_multiple %279, 8 : i32
    %281 = arith.index_cast %280 : i32 to index
    %c0_112 = arith.constant 0 : index
    %282 = vector.load %arg9[%281, %c0_112] : memref<64x512xf32, #tpu.memory_space<vmem>>, vector<8x512xf32>
    %c0_113 = arith.constant 0 : index
    %c0_114 = arith.constant 0 : index
    %283 = vector.load %arg4[%c0_113, %c0_114] : memref<128x512xf32, #tpu.memory_space<vmem>>, vector<128x512xf32>
    %cst_115 = arith.constant dense<0.000000e+00> : vector<8x512xf32>
    %284 = tpu.matmul %278, %283, %cst_115 {dimension_numbers = #tpu.dot_dimension_numbers<[1], [0], [0], [1], [0, 0, 1, 1], [], []>} : vector<8x128xf32>, vector<128x512xf32>, vector<8x512xf32> -> vector<8x512xf32>
    %285 = arith.addf %282, %284 : vector<8x512xf32>
    %286 = vector.extract_strided_slice %285 {offsets = [0, 0], sizes = [8, 128], strides = [1, 1]} : vector<8x512xf32> to vector<8x128xf32>
    %cst_116 = arith.constant 5.000000e-01 : f32
    %287 = vector.broadcast %cst_116 : f32 to vector<8x128xf32>
    %288 = arith.mulf %287, %286 : vector<8x128xf32>
    %289 = math.tanh %288 : vector<8x128xf32>
    %cst_117 = arith.constant 5.000000e-01 : f32
    %290 = vector.broadcast %cst_117 : f32 to vector<8x128xf32>
    %291 = arith.mulf %290, %289 : vector<8x128xf32>
    %cst_118 = arith.constant 5.000000e-01 : f32
    %292 = vector.broadcast %cst_118 : f32 to vector<8x128xf32>
    %293 = arith.addf %291, %292 : vector<8x128xf32>
    %294 = vector.extract_strided_slice %285 {offsets = [0, 128], sizes = [8, 128], strides = [1, 1]} : vector<8x512xf32> to vector<8x128xf32>
    %cst_119 = arith.constant 5.000000e-01 : f32
    %295 = vector.broadcast %cst_119 : f32 to vector<8x128xf32>
    %296 = arith.mulf %295, %294 : vector<8x128xf32>
    %297 = math.tanh %296 : vector<8x128xf32>
    %cst_120 = arith.constant 5.000000e-01 : f32
    %298 = vector.broadcast %cst_120 : f32 to vector<8x128xf32>
    %299 = arith.mulf %298, %297 : vector<8x128xf32>
    %cst_121 = arith.constant 5.000000e-01 : f32
    %300 = vector.broadcast %cst_121 : f32 to vector<8x128xf32>
    %301 = arith.addf %299, %300 : vector<8x128xf32>
    %302 = vector.extract_strided_slice %285 {offsets = [0, 256], sizes = [8, 128], strides = [1, 1]} : vector<8x512xf32> to vector<8x128xf32>
    %303 = math.tanh %302 : vector<8x128xf32>
    %304 = vector.extract_strided_slice %285 {offsets = [0, 384], sizes = [8, 128], strides = [1, 1]} : vector<8x512xf32> to vector<8x128xf32>
    %cst_122 = arith.constant 5.000000e-01 : f32
    %305 = vector.broadcast %cst_122 : f32 to vector<8x128xf32>
    %306 = arith.mulf %305, %304 : vector<8x128xf32>
    %307 = math.tanh %306 : vector<8x128xf32>
    %cst_123 = arith.constant 5.000000e-01 : f32
    %308 = vector.broadcast %cst_123 : f32 to vector<8x128xf32>
    %309 = arith.mulf %308, %307 : vector<8x128xf32>
    %cst_124 = arith.constant 5.000000e-01 : f32
    %310 = vector.broadcast %cst_124 : f32 to vector<8x128xf32>
    %311 = arith.addf %309, %310 : vector<8x128xf32>
    %312 = arith.mulf %301, %276 : vector<8x128xf32>
    %313 = arith.mulf %293, %303 : vector<8x128xf32>
    %314 = arith.addf %312, %313 : vector<8x128xf32>
    %315 = math.tanh %314 : vector<8x128xf32>
    %316 = arith.mulf %311, %315 : vector<8x128xf32>
    %c8_i32_125 = arith.constant 8 : i32
    %c0_126 = arith.constant 0 : index
    %c0_127 = arith.constant 0 : index
    %317 = vector.load %arg10[%c0_126, %c0_127] : memref<8x128xf32, #tpu.memory_space<vmem>>, vector<8x128xf32>
    tpu.vector_store %arg10[%c0_126, %c0_127], %316 {strides = array<i32>} : memref<8x128xf32, #tpu.memory_space<vmem>>, vector<8x128xf32>,
    %c0_128 = arith.constant 0 : index
    %c0_129 = arith.constant 0 : index
    %318 = vector.load %arg11[%c0_128, %c0_129] : memref<8x128xf32, #tpu.memory_space<vmem>>, vector<8x128xf32>
    tpu.vector_store %arg11[%c0_128, %c0_129], %314 {strides = array<i32>} : memref<8x128xf32, #tpu.memory_space<vmem>>, vector<8x128xf32>,
    %c0_i32_130 = arith.constant 0 : i32
    %319 = arith.cmpi eq, %arg1, %c0_i32_130 : i32
    %320 = arith.extui %319 : i1 to i32
    %c0_i32_131 = arith.constant 0 : i32
    %321 = arith.cmpi ne, %320, %c0_i32_131 : i32
    scf.if %321 {
      %c0_132 = arith.constant 0 : index
      %c0_133 = arith.constant 0 : index
      %322 = vector.load %arg6[%c0_132, %c0_133] : memref<128x128xf32, #tpu.memory_space<vmem>>, vector<128x128xf32>
      %cst_134 = arith.constant dense<0.000000e+00> : vector<8x128xf32>
      %323 = tpu.matmul %316, %322, %cst_134 {dimension_numbers = #tpu.dot_dimension_numbers<[1], [0], [0], [1], [0, 0, 1, 1], [], []>} : vector<8x128xf32>, vector<128x128xf32>, vector<8x128xf32> -> vector<8x128xf32>
      %c0_135 = arith.constant 0 : index
      %c0_136 = arith.constant 0 : index
      %324 = vector.load %arg7[%c0_135, %c0_136] : memref<1x128xf32, #tpu.memory_space<vmem>>, vector<1x128xf32>
      %325 = vector.broadcast %324 : vector<1x128xf32> to vector<8x128xf32>
      %326 = arith.addf %323, %325 : vector<8x128xf32>
      %c0_137 = arith.constant 0 : index
      %c0_138 = arith.constant 0 : index
      %327 = vector.load %arg8[%c0_137, %c0_138] : memref<8x128xf32, #tpu.memory_space<vmem>>, vector<8x128xf32>
      tpu.vector_store %arg8[%c0_137, %c0_138], %326 {strides = array<i32>} : memref<8x128xf32, #tpu.memory_space<vmem>>, vector<8x128xf32>,
    } else {
    }
    return
  }
  func.func @transform_0(%arg0: i32, %arg1: i32) -> (i32, i32, i32) {
    %c0_i32 = arith.constant 0 : i32
    %c0_i32_0 = arith.constant 0 : i32
    return %arg0, %arg1, %c0_i32 : i32, i32, i32
  }
  func.func @transform_1(%arg0: i32, %arg1: i32) -> (i32, i32) {
    %c0_i32 = arith.constant 0 : i32
    %c0_i32_0 = arith.constant 0 : i32
    %c0_i32_1 = arith.constant 0 : i32
    return %c0_i32, %c0_i32_0 : i32, i32
  }
  func.func @transform_2(%arg0: i32, %arg1: i32) -> (i32, i32) {
    %c0_i32 = arith.constant 0 : i32
    %c0_i32_0 = arith.constant 0 : i32
    %c0_i32_1 = arith.constant 0 : i32
    return %c0_i32, %c0_i32_0 : i32, i32
  }
  func.func @transform_3(%arg0: i32, %arg1: i32) -> (i32, i32) {
    %c0_i32 = arith.constant 0 : i32
    %c0_i32_0 = arith.constant 0 : i32
    %c0_i32_1 = arith.constant 0 : i32
    return %c0_i32, %c0_i32_0 : i32, i32
  }
  func.func @transform_4(%arg0: i32, %arg1: i32) -> (i32, i32) {
    %c0_i32 = arith.constant 0 : i32
    %c0_i32_0 = arith.constant 0 : i32
    %c0_i32_1 = arith.constant 0 : i32
    return %c0_i32, %c0_i32_0 : i32, i32
  }
  func.func @transform_5(%arg0: i32, %arg1: i32) -> (i32, i32) {
    %c0_i32 = arith.constant 0 : i32
    %c0_i32_0 = arith.constant 0 : i32
    %c0_i32_1 = arith.constant 0 : i32
    return %c0_i32, %c0_i32_0 : i32, i32
  }
  func.func @transform_6(%arg0: i32, %arg1: i32) -> (i32, i32) {
    %c0_i32 = arith.constant 0 : i32
    %c0_i32_0 = arith.constant 0 : i32
    return %arg0, %c0_i32 : i32, i32
  }
}

</mosaic_0001>

<bundles_post_ra>
// kernel: tpu_custom_call.1
= control target key start
LH: loop header
LB: loop body
LE: loop exit
PB: predicated region body
PF: predicated region fallthrough
CT: control target
= control target key end

     0   :  { %11 = vsyncpa [#allocation6], 0  ;;  %s3348_s0 = inlined_call_operand.vmem [shape: f32[1,64,16], index: 0, kind: input, shape index: {}]   ;;  %s3349_s1 = inlined_call_operand.vmem [shape: f32[16,512], index: 1, kind: input, shape index: {}]   ;;  %s3350_s2 = inlined_call_operand.hbm [shape: f32[128,512], index: 2, kind: input, shape index: {}]   ;;  %s3351_s3 = inlined_call_operand.vmem [shape: f32[1,512], index: 3, kind: input, shape index: {}]   ;;  %s3352_s4 = inlined_call_operand.hbm [shape: f32[128,128], index: 4, kind: input, shape index: {}]   ;;  %s3353_s5 = inlined_call_operand.vmem [shape: f32[1,128], index: 5, kind: input, shape index: {}]   ;;  %s3354_s6 = inlined_call_operand.hbm [shape: f32[8,128], index: 6, kind: output, shape index: {}]  }
   0x1   :  { %12 = vsyncpa [#allocation9], 0 }
   0x2   :  { %13 = vsyncpa [#allocation7], 0  ;;  %s2774_s21 = smov [#allocation5]   ;;  %s2702_s25 = scalar_lea.hbm %s3350_s2, 8192 }
   0x3   :  { %s23_s22 = sshll.u32 %s2774_s21, 4  ;;  %p2703_p0 = scmp.ne.s32.totalorder %s3350_s2, %s2702_s25  ;;  %s24_s22 = int_to_ptr.vmem [resolvable:$true] %s23_s22 }
   0x4   :  { %p2706_p1 = scmp.lt.u32.totalorder %s2702_s25, %s3350_s2 }
   0x6   :  { %p2708_p2 = pnand %p2706_p1, %p2703_p0 }
   0x8   :  { %2711 = shalt.err (!%p2708_p2)
}
   0x9   :  { %s2712_s30 = scalar_lea.vmem %s24_s22, 8192  ;;  %p2717_p4 = scmp.lt.s32.totalorder %s24_s22, %s24_s22 }
   0xa   :  { %p2713_p3 = scmp.ne.s32.totalorder %s24_s22, %s2712_s30  ;;  %p2718_p5 = scmp.lt.s32.totalorder %s2712_s30, %s2712_s30 }
   0xc   :  { %p2719_p6 = por %p2718_p5, %p2717_p4 }
   0xe   :  { %p2720_p7 = pnand %p2719_p6, %p2713_p3 }
  0x10   :  { %2723 = shalt.err (!%p2720_p7)
}
  0x11   :  { %s2775_s7 = smov 512   ;;  %s2776_s8 = smov 32  }
  0x12   :  { %29 = dma.hbm_to_vmem [thread:$0]  %s3350_s2, 8192, %s24_s22, [#allocation6], %s2775_s7, %s2775_s7, %s2776_s8  }
  0x13   :  { %s2777_s11 = smov [#allocation8]   ;;  %s2724_s15 = scalar_lea.hbm %s3352_s4, 2048 }
  0x14   :  { %s37_s12 = sshll.u32 %s2777_s11, 4  ;;  %p2725_p8 = scmp.ne.s32.totalorder %s3352_s4, %s2724_s15  ;;  %s38_s12 = int_to_ptr.vmem [resolvable:$true] %s37_s12 }
  0x15   :  { %p2728_p9 = scmp.lt.u32.totalorder %s2724_s15, %s3352_s4 }
  0x17   :  { %p2730_p10 = pnand %p2728_p9, %p2725_p8 }
  0x19   :  { %2733 = shalt.err (!%p2730_p10)
}
  0x1a   :  { %s2734_s20 = scalar_lea.vmem %s38_s12, 2048  ;;  %p2739_p12 = scmp.lt.s32.totalorder %s38_s12, %s38_s12 }
  0x1b   :  { %p2735_p11 = scmp.ne.s32.totalorder %s38_s12, %s2734_s20  ;;  %p2740_p13 = scmp.lt.s32.totalorder %s2734_s20, %s2734_s20 }
  0x1d   :  { %p2741_p0 = por %p2740_p13, %p2739_p12 }
  0x1f   :  { %p2742_p1 = pnand %p2741_p0, %p2735_p11 }
  0x21   :  { %2745 = shalt.err (!%p2742_p1)
}
  0x22   :  { %s2778_s2 = smov 128   ;;  %s2779_s21 = smov 8  }
  0x23   :  { %43 = dma.hbm_to_vmem [thread:$0]  %s3352_s4, 2048, %s38_s12, [#allocation9], %s2778_s2, %s2778_s2, %s2779_s21  }
  0x24   :  { %2768 = dma.done.wait [#allocation6], 8192  }
  0x25   :  { %2769 = vsyncadd [#allocation6], 4294959104 }
  0x26   :  { %2770 = dma.done.wait [#allocation9], 2048  }
  0x27   :  { %2771 = vsyncadd [#allocation9], 4294965248  ;;  %v2780_v0 = vmov 0.0   ;;  %v67_v1 = vld [vmem:[%s3349_s1 + $0x8] sm:$0xff]  ;;  %v69_v3 = vld [vmem:[%s3349_s1 + $0x18] sm:$0xff]  ;;  %vm96_vm0 = vcmask 130048  }
  0x28   :  { %185 = vmatprep.mubr.f32.mxu0 %v2780_v0  ;;  %298 = vmatprep.mubr.f32.mxu1 %v2780_v0  ;;  %v71_v2 = vld [vmem:[%s3349_s1 + $0x28] sm:$0xff]  ;;  %v73_v5 = vld [vmem:[%s3349_s1 + $0x38] sm:$0xff]  ;;  %v66_v6 = vld [vmem:[%s3349_s1] sm:$0xff]  ;;  %vm2782_vm1 = vmmov 0   ;;  %s2783_s30 = smov [#allocation10]  }
  0x29   :  { %v2004_v4 = vpack.c.bf16 %v71_v2, %v67_v1  ;;  %v70_v7 = vld [vmem:[%s3349_s1 + $0x20] sm:$0xff]  ;;  %v2008_v8 = vpack.c.bf16 %v73_v5, %v69_v3  ;;  %v68_v10 = vld [vmem:[%s3349_s1 + $0x10] sm:$0xff]  ;;  %v389_v14 = vld [vmem:[#allocation5 + $0x8] sm:$0xff]  ;;  %s1918_s7 = sshll.u32 %s2783_s30, 4  ;;  %s1919_s7 = int_to_ptr.vmem [resolvable:$true] %s1918_s7 }
  0x2a   :  { %v2006_v9 = vpack.c.bf16 %v70_v7, %v66_v6  ;;  %v72_v11 = vld [vmem:[%s3349_s1 + $0x30] sm:$0xff]  ;;  %v58_v12 = vld [vmem:[%s3348_s0] sm:$0xff]  ;;  %v393_v15 = vld [vmem:[#allocation5 + $0x28] sm:$0xff]  ;;  %s2746_s8 = scalar_lea.vmem %s1919_s7, 128  ;;  %p2751_p3 = scmp.lt.s32.totalorder %s1919_s7, %s1919_s7 }
  0x2b   :  { %2005 = vmatprep.subr.bf16.mxu0 %v2004_v4  ;;  %v2010_v13 = vpack.c.bf16 %v72_v11, %v68_v10  ;;  %v391_v16 = vld [vmem:[#allocation5 + $0x18] sm:$0xff]  ;;  %2009 = vmatprep.subr.bf16.mxu1 %v2008_v8  ;;  %v2872_v17 = vpack.c.bf16 %v393_v15, %v389_v14  ;;  %v388_v19 = vld [vmem:[#allocation5] sm:$0xff]  ;;  %v390_v23 = vld [vmem:[#allocation5 + $0x10] sm:$0xff]  ;;  %p2747_p2 = scmp.ne.s32.totalorder %s1919_s7, %s2746_s8  ;;  %p2752_p4 = scmp.lt.s32.totalorder %s2746_s8, %s2746_s8 }
  0x2c   :  { %2007 = vmatpush1.bf16.msra.mxu0 %v2006_v9  ;;  %v395_v18 = vld [vmem:[#allocation5 + $0x38] sm:$0xff]  ;;  %v392_v20 = vld [vmem:[#allocation5 + $0x20] sm:$0xff]  ;;  %v394_v24 = vld [vmem:[#allocation5 + $0x30] sm:$0xff] }
  0x2d   :  { %2011 = vmatpush1.bf16.msra.mxu1 %v2010_v13  ;;  %v2874_v21 = vpack.c.bf16 %v395_v18, %v391_v16  ;;  %v2876_v22 = vpack.c.bf16 %v392_v20, %v388_v19  ;;  %2013 = vmatprep.subr.bf16.mxu0 %v2872_v17  ;;  %v2879_v25 = vpack.c.bf16 %v394_v24, %v390_v23  ;;  %v397_v26 = vld [vmem:[#allocation5 + $0x48] sm:$0xff]  ;;  %v399_v28 = vld [vmem:[#allocation5 + $0x58] sm:$0xff]  ;;  %v396_v31 = vld [vmem:[#allocation5 + $0x40] sm:$0xff]  ;;  %p2753_p5 = por %p2752_p4, %p2751_p3 }
  0x2e   :  { %v401_v27 = vld [vmem:[#allocation5 + $0x68] sm:$0xff]  ;;  %v403_v30 = vld [vmem:[#allocation5 + $0x78] sm:$0xff]  ;;  %v400_v32 = vld [vmem:[#allocation5 + $0x60] sm:$0xff] }
  0x2f   :  { %1935 = vmatmul.mubr.msk.f32.vlgmr.msra.gmra.mrb[0].mxu0 %vm96_vm0, %v58_v12  ;;  %2045 = vmatprep.subr.bf16.mxu1 %v2874_v21  ;;  %v2883_v29 = vpack.c.bf16 %v401_v27, %v397_v26  ;;  %v59_v33 = vld [vmem:[%s3348_s0 + $0x8] sm:$0xff]  ;;  %v2890_v34 = vpack.c.bf16 %v403_v30, %v399_v28  ;;  %v2892_v35 = vpack.c.bf16 %v400_v32, %v396_v31  ;;  %v398_v36 = vld [vmem:[#allocation5 + $0x50] sm:$0xff]  ;;  %v407_v41 = vld [vmem:[#allocation5 + $0x98] sm:$0xff]  ;;  %p2754_p6 = pnand %p2753_p5, %p2747_p2 }
  0x30   :  { %1943 = vmatmul.mubr.msk.f32.vlgmr.msra.gmra.mrb[0].mxu1 %vm96_vm0, %v58_v12  ;;  %2015 = vmatpush1.bf16.msra.mxu0 %v2876_v22  ;;  %v402_v37 = vld [vmem:[#allocation5 + $0x70] sm:$0xff]  ;;  %v405_v39 = vld [vmem:[#allocation5 + $0x88] sm:$0xff]  ;;  %v411_v43 = vld [vmem:[#allocation5 + $0xb8] sm:$0xff] }
  0x31   :  { %2047 = vmatpush1.bf16.msra.mxu1 %v2879_v25  ;;  %191 = vmatprep.mubr.f32.mxu0 %v2780_v0  ;;  %v2896_v38 = vpack.c.bf16 %v402_v37, %v398_v36  ;;  %v409_v40 = vld [vmem:[#allocation5 + $0xa8] sm:$0xff]  ;;  %v404_v44 = vld [vmem:[#allocation5 + $0x80] sm:$0xff]  ;;  %v60_v46 = vld [vmem:[%s3348_s0 + $0x10] sm:$0xff]  ;;  %v2907_v47 = vpack.c.bf16 %v411_v43, %v407_v41 }
  0x32   :  { %304 = vmatprep.mubr.f32.mxu1 %v2780_v0  ;;  %2017 = vmatprep.subr.bf16.mxu0 %v2883_v29  ;;  %v2900_v42 = vpack.c.bf16 %v409_v40, %v405_v39  ;;  %v408_v45 = vld [vmem:[#allocation5 + $0xa0] sm:$0xff]  ;;  %v406_v48 = vld [vmem:[#allocation5 + $0x90] sm:$0xff]  ;;  %v413_v51 = vld [vmem:[#allocation5 + $0xc8] sm:$0xff] }
  0x33   :  { %1936 = vmatmul.mubr.msk.f32.gmra.mrb[2].mxu0 %vm96_vm0, %v59_v33  ;;  %2049 = vmatprep.subr.bf16.mxu1 %v2890_v34  ;;  %v410_v49 = vld [vmem:[#allocation5 + $0xb0] sm:$0xff]  ;;  %v2911_v50 = vpack.c.bf16 %v408_v45, %v404_v44  ;;  %v417_v52 = vld [vmem:[#allocation5 + $0xe8] sm:$0xff]  ;;  %v415_v53 = vld [vmem:[#allocation5 + $0xd8] sm:$0xff] }
  0x34   :  { %1944 = vmatmul.mubr.msk.f32.gmra.mrb[2].mxu1 %vm96_vm0, %v59_v33  ;;  %2019 = vmatpush1.bf16.msra.mxu0 %v2892_v35  ;;  %v2915_v54 = vpack.c.bf16 %v410_v49, %v406_v48  ;;  %v419_v55 = vld [vmem:[#allocation5 + $0xf8] sm:$0xff]  ;;  %v412_v56 = vld [vmem:[#allocation5 + $0xc0] sm:$0xff]  ;;  %v2919_v58 = vpack.c.bf16 %v417_v52, %v413_v51  ;;  %v414_v59 = vld [vmem:[#allocation5 + $0xd0] sm:$0xff] }
  0x35   :  { %2051 = vmatpush1.bf16.msra.mxu1 %v2896_v38  ;;  %197 = vmatprep.mubr.f32.mxu0 %v2780_v0  ;;  %v416_v57 = vld [vmem:[#allocation5 + $0xe0] sm:$0xff]  ;;  %v418_v60 = vld [vmem:[#allocation5 + $0xf0] sm:$0xff]  ;;  %v2923_v61 = vpack.c.bf16 %v419_v55, %v415_v53  ;;  %v421_v62 = vld [vmem:[#allocation5 + $0x108] sm:$0xff] }
  0x36   :  { %310 = vmatprep.mubr.f32.mxu1 %v2780_v0  ;;  %2021 = vmatprep.subr.bf16.mxu0 %v2900_v42  ;;  %v425_v63 = vld [vmem:[#allocation5 + $0x128] sm:$0xff]  ;;  %v61_v1 = vld [vmem:[%s3348_s0 + $0x18] sm:$0xff]  ;;  %v2930_v2 = vpack.c.bf16 %v416_v57, %v412_v56  ;;  %v2934_v5 = vpack.c.bf16 %v418_v60, %v414_v59  ;;  %v420_v6 = vld [vmem:[#allocation5 + $0x100] sm:$0xff] }
  0x37   :  { %1937 = vmatmul.mubr.msk.f32.gmra.mrb[4].mxu0 %vm96_vm0, %v60_v46  ;;  %2053 = vmatprep.subr.bf16.mxu1 %v2907_v47  ;;  %v423_v3 = vld [vmem:[#allocation5 + $0x118] sm:$0xff]  ;;  %v424_v7 = vld [vmem:[#allocation5 + $0x120] sm:$0xff]  ;;  %v2938_v8 = vpack.c.bf16 %v425_v63, %v421_v62  ;;  %v422_v9 = vld [vmem:[#allocation5 + $0x110] sm:$0xff] }
  0x38   :  { %1945 = vmatmul.mubr.msk.f32.gmra.mrb[4].mxu1 %vm96_vm0, %v60_v46  ;;  %2023 = vmatpush1.bf16.msra.mxu0 %v2911_v50  ;;  %v427_v4 = vld [vmem:[#allocation5 + $0x138] sm:$0xff]  ;;  %v426_v10 = vld [vmem:[#allocation5 + $0x130] sm:$0xff]  ;;  %v429_v12 = vld [vmem:[#allocation5 + $0x148] sm:$0xff]  ;;  %v2949_v15 = vpack.c.bf16 %v424_v7, %v420_v6  ;;  %v76_v7 = vlaneseq }
  0x39   :  { %2055 = vmatpush1.bf16.msra.mxu1 %v2915_v54  ;;  %203 = vmatprep.mubr.f32.mxu0 %v2780_v0  ;;  %v2942_v11 = vpack.c.bf16 %v427_v4, %v423_v3  ;;  %v433_v13 = vld [vmem:[#allocation5 + $0x168] sm:$0xff]  ;;  %v62_v14 = vld [vmem:[%s3348_s0 + $0x20] sm:$0xff]  ;;  %v431_v16 = vld [vmem:[#allocation5 + $0x158] sm:$0xff]  ;;  %v2953_v19 = vpack.c.bf16 %v426_v10, %v422_v9 }
  0x3a   :  { %316 = vmatprep.mubr.f32.mxu1 %v2780_v0  ;;  %2025 = vmatprep.subr.bf16.mxu0 %v2919_v58  ;;  %v435_v18 = vld [vmem:[#allocation5 + $0x178] sm:$0xff]  ;;  %v428_v20 = vld [vmem:[#allocation5 + $0x140] sm:$0xff]  ;;  %v2957_v24 = vpack.c.bf16 %v433_v13, %v429_v12  ;;  %v430_v26 = vld [vmem:[#allocation5 + $0x150] sm:$0xff]  ;;  %v77_v9 = vshrl.u32 %v76_v7, 7 }
  0x3b   :  { %1938 = vmatmul.mubr.msk.f32.gmra.mrb[6].mxu0 %vm96_vm0, %v61_v1  ;;  %2057 = vmatprep.subr.bf16.mxu1 %v2923_v61  ;;  %v432_v23 = vld [vmem:[#allocation5 + $0x160] sm:$0xff]  ;;  %v434_v27 = vld [vmem:[#allocation5 + $0x170] sm:$0xff]  ;;  %v2961_v28 = vpack.c.bf16 %v435_v18, %v431_v16  ;;  %v437_v30 = vld [vmem:[#allocation5 + $0x188] sm:$0xff] }
  0x3c   :  { %1946 = vmatmul.mubr.msk.f32.gmra.mrb[6].mxu1 %vm96_vm0, %v61_v1  ;;  %2027 = vmatpush1.bf16.msra.mxu0 %v2930_v2  ;;  %v441_v31 = vld [vmem:[#allocation5 + $0x1a8] sm:$0xff]  ;;  %v2968_v33 = vpack.c.bf16 %v432_v23, %v428_v20  ;;  %v439_v36 = vld [vmem:[#allocation5 + $0x198] sm:$0xff]  ;;  %v2972_v39 = vpack.c.bf16 %v434_v27, %v430_v26  ;;  %v436_v40 = vld [vmem:[#allocation5 + $0x180] sm:$0xff]  ;;  %v78_v10 = vsub.s32 0, %v77_v9  ;;  %v82_v13 = vsub.s32 1, %v77_v9 }
  0x3d   :  { %2059 = vmatpush1.bf16.msra.mxu1 %v2934_v5  ;;  %209 = vmatprep.mubr.f32.mxu0 %v2780_v0  ;;  %v63_v32 = vld [vmem:[%s3348_s0 + $0x28] sm:$0xff]  ;;  %v443_v37 = vld [vmem:[#allocation5 + $0x1b8] sm:$0xff]  ;;  %v440_v41 = vld [vmem:[#allocation5 + $0x1a0] sm:$0xff]  ;;  %v2976_v43 = vpack.c.bf16 %v441_v31, %v437_v30  ;;  %v86_v16 = vsub.s32 2, %v77_v9  ;;  %v90_v31 = vsub.s32 3, %v77_v9 }
  0x3e   :  { %322 = vmatprep.mubr.f32.mxu1 %v2780_v0  ;;  %2029 = vmatprep.subr.bf16.mxu0 %v2938_v8  ;;  %v438_v44 = vld [vmem:[#allocation5 + $0x190] sm:$0xff]  ;;  %v2980_v46 = vpack.c.bf16 %v443_v37, %v439_v36  ;;  %v445_v48 = vld [vmem:[#allocation5 + $0x1c8] sm:$0xff]  ;;  %v2987_v52 = vpack.c.bf16 %v440_v41, %v436_v40  ;;  %v447_v53 = vld [vmem:[#allocation5 + $0x1d8] sm:$0xff] }
  0x3f   :  { %1939 = vmatmul.mubr.msk.f32.gmra.mrb[8].mxu0 %vm96_vm0, %v62_v14  ;;  %2061 = vmatprep.subr.bf16.mxu1 %v2942_v11  ;;  %v442_v45 = vld [vmem:[#allocation5 + $0x1b0] sm:$0xff]  ;;  %v449_v49 = vld [vmem:[#allocation5 + $0x1e8] sm:$0xff]  ;;  %v451_v55 = vld [vmem:[#allocation5 + $0x1f8] sm:$0xff] }
  0x40   :  { %1947 = vmatmul.mubr.msk.f32.gmra.mrb[8].mxu1 %vm96_vm0, %v62_v14  ;;  %2031 = vmatpush1.bf16.msra.mxu0 %v2949_v15  ;;  %v64_v51 = vld [vmem:[%s3348_s0 + $0x30] sm:$0xff]  ;;  %v2991_v56 = vpack.c.bf16 %v442_v45, %v438_v44  ;;  %v444_v57 = vld [vmem:[#allocation5 + $0x1c0] sm:$0xff]  ;;  %v2995_v60 = vpack.c.bf16 %v449_v49, %v445_v48  ;;  %v2999_v1 = vpack.c.bf16 %v451_v55, %v447_v53  ;;  %v65_v3 = vld [vmem:[%s3348_s0 + $0x38] sm:$0xff] }
  0x41   :  { %2063 = vmatpush1.bf16.msra.mxu1 %v2953_v19  ;;  %215 = vmatprep.mubr.f32.mxu0 %v2780_v0  ;;  %v448_v59 = vld [vmem:[#allocation5 + $0x1e0] sm:$0xff]  ;;  %v446_v62 = vld [vmem:[#allocation5 + $0x1d0] sm:$0xff] }
  0x42   :  { %328 = vmatprep.mubr.f32.mxu1 %v2780_v0  ;;  %2033 = vmatprep.subr.bf16.mxu0 %v2957_v24  ;;  %v450_v63 = vld [vmem:[#allocation5 + $0x1f0] sm:$0xff]  ;;  %v3006_v4 = vpack.c.bf16 %v448_v59, %v444_v57  ;;  %v74_v12 = vld [vmem:[%s3351_s3] sm:$0xf] }
  0x43   :  { %1940 = vmatmul.mubr.msk.f32.gmra.mrb[10].mxu0 %vm96_vm0, %v63_v32  ;;  %2065 = vmatprep.subr.bf16.mxu1 %v2961_v28  ;;  %v3010_v6 = vpack.c.bf16 %v450_v63, %v446_v62  ;;  %v3062_v14 = vrot.slane %v74_v12, %v78_v10  ;;  %v3064_v18 = vrot.slane %v74_v12, %v82_v13 }
  0x44   :  { %1948 = vmatmul.mubr.msk.f32.gmra.mrb[10].mxu1 %vm96_vm0, %v63_v32  ;;  %2035 = vmatpush1.bf16.msra.mxu0 %v2968_v33  ;;  %v3067_v26 = vrot.slane %v74_v12, %v86_v16  ;;  %v3071_v44 = vrot.slane %v74_v12, %v90_v31 }
  0x45   :  { %2067 = vmatpush1.bf16.msra.mxu1 %v2972_v39  ;;  %221 = vmatprep.mubr.f32.mxu0 %v2780_v0 }
  0x46   :  { %334 = vmatprep.mubr.f32.mxu1 %v2780_v0  ;;  %2037 = vmatprep.subr.bf16.mxu0 %v2976_v43 }
  0x47   :  { %1941 = vmatmul.mubr.msk.f32.gmra.mrb[12].mxu0 %vm96_vm0, %v64_v51  ;;  %2069 = vmatprep.subr.bf16.mxu1 %v2980_v46 }
  0x48   :  { %1949 = vmatmul.mubr.msk.f32.gmra.mrb[12].mxu1 %vm96_vm0, %v64_v51  ;;  %2039 = vmatpush1.bf16.msra.mxu0 %v2987_v52 }
  0x49   :  { %2071 = vmatpush1.bf16.msra.mxu1 %v2991_v56  ;;  %227 = vmatprep.mubr.f32.mxu0 %v2780_v0 }
  0x4a   :  { %340 = vmatprep.mubr.f32.mxu1 %v2780_v0  ;;  %2041 = vmatprep.subr.bf16.mxu0 %v2995_v60 }
  0x4b   :  { %1942 = vmatmul.mubr.msk.f32.gmra.mrb[14].mxu0 %vm96_vm0, %v65_v3  ;;  %2073 = vmatprep.subr.bf16.mxu1 %v2999_v1 }
  0x4c   :  { %1950 = vmatmul.mubr.msk.f32.gmra.mrb[14].mxu1 %vm96_vm0, %v65_v3  ;;  %2043 = vmatpush1.bf16.msra.mxu0 %v3006_v4 }
  0x4d   :  { %2075 = vmatpush1.bf16.msra.mxu1 %v3010_v6  ;;  %516 = vmatprep.mubr.f32.mxu0 %v2780_v0 }
  0x4e   :  { %587 = vmatprep.mubr.f32.mxu1 %v2780_v0  ;;  %2077 = vmatprep.subr.bf16.mxu0 %v2872_v17 }
  0x4f   :  { %517 = vmatmul.mubr.f32.vlgmr.msra.gmra.mrb[0].mxu0 %v2780_v0  ;;  %2109 = vmatprep.subr.bf16.mxu1 %v2874_v21 }
  0x50   :  { %588 = vmatmul.mubr.f32.vlgmr.msra.gmra.mrb[0].mxu1 %v2780_v0  ;;  %2079 = vmatpush1.bf16.msra.mxu0 %v2876_v22 }
  0x51   :  { %2111 = vmatpush1.bf16.msra.mxu1 %v2879_v25  ;;  %2081 = vmatprep.subr.bf16.mxu0 %v2883_v29 }
  0x52   :  { %2113 = vmatprep.subr.bf16.mxu1 %v2890_v34  ;;  %687 = vmatprep.mubr.f32.mxu0 %v2780_v0 }
  0x53   :  { %758 = vmatprep.mubr.f32.mxu1 %v2780_v0 }
  0x54   :  { %2083 = vmatpush1.bf16.msra.mxu0 %v2892_v35 }
  0x55   :  { %2115 = vmatpush1.bf16.msra.mxu1 %v2896_v38  ;;  %2085 = vmatprep.subr.bf16.mxu0 %v2900_v42 }
  0x56   :  { %2117 = vmatprep.subr.bf16.mxu1 %v2907_v47 }
  0x58   :  { %2087 = vmatpush1.bf16.msra.mxu0 %v2911_v50 }
  0x59   :  { %2119 = vmatpush1.bf16.msra.mxu1 %v2915_v54  ;;  %2089 = vmatprep.subr.bf16.mxu0 %v2919_v58 }
  0x5a   :  { %2121 = vmatprep.subr.bf16.mxu1 %v2923_v61 }
  0x5c   :  { %2091 = vmatpush1.bf16.msra.mxu0 %v2930_v2 }
  0x5d   :  { %2123 = vmatpush1.bf16.msra.mxu1 %v2934_v5  ;;  %2093 = vmatprep.subr.bf16.mxu0 %v2938_v8 }
  0x5e   :  { %2125 = vmatprep.subr.bf16.mxu1 %v2942_v11 }
  0x60   :  { %2095 = vmatpush1.bf16.msra.mxu0 %v2949_v15 }
  0x61   :  { %2127 = vmatpush1.bf16.msra.mxu1 %v2953_v19  ;;  %2097 = vmatprep.subr.bf16.mxu0 %v2957_v24 }
  0x62   :  { %2129 = vmatprep.subr.bf16.mxu1 %v2961_v28 }
  0x64   :  { %2099 = vmatpush1.bf16.msra.mxu0 %v2968_v33 }
  0x65   :  { %2131 = vmatpush1.bf16.msra.mxu1 %v2972_v39  ;;  %2101 = vmatprep.subr.bf16.mxu0 %v2976_v43 }
  0x66   :  { %2133 = vmatprep.subr.bf16.mxu1 %v2980_v46 }
  0x68   :  { %2103 = vmatpush1.bf16.msra.mxu0 %v2987_v52 }
  0x69   :  { %2135 = vmatpush1.bf16.msra.mxu1 %v2991_v56  ;;  %2105 = vmatprep.subr.bf16.mxu0 %v2995_v60 }
  0x6a   :  { %2137 = vmatprep.subr.bf16.mxu1 %v2999_v1 }
  0x6c   :  { %2107 = vmatpush1.bf16.msra.mxu0 %v3006_v4 }
  0x6d   :  { %2139 = vmatpush1.bf16.msra.mxu1 %v3010_v6  ;;  %2141 = vmatprep.subr.bf16.mxu0 %v2872_v17 }
  0x6e   :  { %2173 = vmatprep.subr.bf16.mxu1 %v2874_v21 }
 0x122   :  { %v518_v20 = vpop.f32.mrb[0].mxu0 }
 0x123   :  { %v2548_v23 = vadd.f32 %v518_v20, %v3062_v14  ;;  %v589_v27 = vpop.f32.mrb[0].mxu1  ;;  %v520_v30 = vpop.f32.mrb[1].mxu0 }
 0x124   :  { %v2549_v32 = vadd.f32 %v520_v30, %v3064_v18  ;;  %v591_v36 = vpop.f32.mrb[1].mxu1  ;;  %v2564_v41 = vadd.f32 %v589_v27, %v3067_v26 }
 0x125   :  { %v598_v37 = vmul.f32 0.5, %v2548_v23  ;;  %v2565_v45 = vadd.f32 %v591_v36, %v3071_v44 }
 0x126   :  { %v602_v40 = vmul.f32 0.5, %v2549_v32 }
 0x127   :  { %2622 = vtanh.f32 %v598_v37  ;;  %v607_v48 = vmul.f32 0.5, %v2565_v45 }
 0x128   :  { %2624 = vtanh.f32 %v602_v40 }
 0x129   :  { %2626 = vtanh.f32 %v2564_v41 }
 0x12a   :  { %2628 = vtanh.f32 %v607_v48 }
 0x131   :  { %v2623_v49 = vpop.eup %2622 }
 0x132   :  { %v2625_v51 = vpop.eup %2624  ;;  %v600_v53 = vmul.f32 0.5, %v2623_v49 }
 0x133   :  { %v604_v55 = vmul.f32 0.5, %v2625_v51  ;;  %v2627_v59 = vpop.eup %2626 }
 0x134   :  { %v601_v57 = vadd.f32 0.5, %v600_v53  ;;  %v2629_v9 = vpop.eup %2628 }
 0x135   :  { %v605_v62 = vadd.f32 0.5, %v604_v55  ;;  %v609_v10 = vmul.f32 0.5, %v2629_v9 }
 0x136   :  { %v612_v63 = vmul.f32 %v2627_v59, %v601_v57 }
 0x137   :  { %v611_v3 = vmul.f32 0.0, %v605_v62  ;;  %v610_v12 = vadd.f32 0.5, %v609_v10 }
 0x139   :  { %v3074_v7 = vadd.f32 %v612_v63, %v611_v3 }
 0x13b   :  { %2630 = vtanh.f32 %v3074_v7 }
 0x145   :  { %v2631_v13 = vpop.eup %2630 }
 0x146   :  { %v615_v16 = vmul.f32 %v2631_v13, %v610_v12 }
 0x148   :  { %688 = vmatmul.mubr.f32.vlgmr.msra.gmra.mrb[2].mxu0 %v615_v16  ;;  %759 = vmatmul.mubr.f32.vlgmr.msra.gmra.mrb[2].mxu1 %v615_v16 }
 0x149   :  { %2143 = vmatpush1.bf16.msra.mxu0 %v2876_v22  ;;  %2175 = vmatpush1.bf16.msra.mxu1 %v2879_v25 }
 0x14a   :  { %2145 = vmatprep.subr.bf16.mxu0 %v2883_v29  ;;  %2177 = vmatprep.subr.bf16.mxu1 %v2890_v34 }
 0x14b   :  { %858 = vmatprep.mubr.f32.mxu0 %v2780_v0  ;;  %929 = vmatprep.mubr.f32.mxu1 %v2780_v0 }
 0x14d   :  { %2147 = vmatpush1.bf16.msra.mxu0 %v2892_v35  ;;  %2179 = vmatpush1.bf16.msra.mxu1 %v2896_v38 }
 0x14e   :  { %2149 = vmatprep.subr.bf16.mxu0 %v2900_v42  ;;  %2181 = vmatprep.subr.bf16.mxu1 %v2907_v47 }
 0x151   :  { %2151 = vmatpush1.bf16.msra.mxu0 %v2911_v50  ;;  %2183 = vmatpush1.bf16.msra.mxu1 %v2915_v54 }
 0x152   :  { %2153 = vmatprep.subr.bf16.mxu0 %v2919_v58  ;;  %2185 = vmatprep.subr.bf16.mxu1 %v2923_v61 }
 0x155   :  { %2155 = vmatpush1.bf16.msra.mxu0 %v2930_v2  ;;  %2187 = vmatpush1.bf16.msra.mxu1 %v2934_v5 }
 0x156   :  { %2157 = vmatprep.subr.bf16.mxu0 %v2938_v8  ;;  %2189 = vmatprep.subr.bf16.mxu1 %v2942_v11 }
 0x159   :  { %2159 = vmatpush1.bf16.msra.mxu0 %v2949_v15  ;;  %2191 = vmatpush1.bf16.msra.mxu1 %v2953_v19 }
 0x15a   :  { %2161 = vmatprep.subr.bf16.mxu0 %v2957_v24  ;;  %2193 = vmatprep.subr.bf16.mxu1 %v2961_v28 }
 0x15d   :  { %2163 = vmatpush1.bf16.msra.mxu0 %v2968_v33  ;;  %2195 = vmatpush1.bf16.msra.mxu1 %v2972_v39 }
 0x15e   :  { %2165 = vmatprep.subr.bf16.mxu0 %v2976_v43  ;;  %2197 = vmatprep.subr.bf16.mxu1 %v2980_v46 }
 0x161   :  { %2167 = vmatpush1.bf16.msra.mxu0 %v2987_v52  ;;  %2199 = vmatpush1.bf16.msra.mxu1 %v2991_v56 }
 0x162   :  { %2169 = vmatprep.subr.bf16.mxu0 %v2995_v60  ;;  %2201 = vmatprep.subr.bf16.mxu1 %v2999_v1 }
 0x165   :  { %2171 = vmatpush1.bf16.msra.mxu0 %v3006_v4  ;;  %2203 = vmatpush1.bf16.msra.mxu1 %v3010_v6 }
 0x166   :  { %2205 = vmatprep.subr.bf16.mxu0 %v2872_v17  ;;  %2237 = vmatprep.subr.bf16.mxu1 %v2874_v21 }
 0x21b   :  { %v689_v20 = vpop.f32.mrb[2].mxu0  ;;  %v760_v23 = vpop.f32.mrb[2].mxu1 }
 0x21c   :  { %v2550_v27 = vadd.f32 %v689_v20, %v3062_v14  ;;  %v691_v30 = vpop.f32.mrb[3].mxu0  ;;  %v762_v31 = vpop.f32.mrb[3].mxu1  ;;  %v2566_v40 = vadd.f32 %v760_v23, %v3067_v26 }
 0x21d   :  { %v2551_v32 = vadd.f32 %v691_v30, %v3064_v18  ;;  %v2567_v41 = vadd.f32 %v762_v31, %v3071_v44 }
 0x21e   :  { %v769_v36 = vmul.f32 0.5, %v2550_v27 }
 0x21f   :  { %v773_v37 = vmul.f32 0.5, %v2551_v32  ;;  %v778_v45 = vmul.f32 0.5, %v2567_v41 }
 0x220   :  { %2632 = vtanh.f32 %v769_v36 }
 0x221   :  { %2634 = vtanh.f32 %v773_v37 }
 0x222   :  { %2636 = vtanh.f32 %v2566_v40 }
 0x223   :  { %2638 = vtanh.f32 %v778_v45 }
 0x22a   :  { %v2633_v48 = vpop.eup %2632 }
 0x22b   :  { %v2635_v49 = vpop.eup %2634  ;;  %v771_v51 = vmul.f32 0.5, %v2633_v48 }
 0x22c   :  { %v775_v53 = vmul.f32 0.5, %v2635_v49  ;;  %v2637_v57 = vpop.eup %2636 }
 0x22d   :  { %v772_v55 = vadd.f32 0.5, %v771_v51  ;;  %v2639_v9 = vpop.eup %2638 }
 0x22e   :  { %v776_v59 = vadd.f32 0.5, %v775_v53  ;;  %v780_v10 = vmul.f32 0.5, %v2639_v9 }
 0x22f   :  { %v783_v62 = vmul.f32 %v2637_v57, %v772_v55 }
 0x230   :  { %v782_v63 = vmul.f32 %v776_v59, %v3074_v7  ;;  %v781_v12 = vadd.f32 0.5, %v780_v10 }
 0x232   :  { %v3116_v3 = vadd.f32 %v783_v62, %v782_v63 }
 0x234   :  { %2640 = vtanh.f32 %v3116_v3 }
 0x23e   :  { %v2641_v13 = vpop.eup %2640 }
 0x23f   :  { %v786_v16 = vmul.f32 %v2641_v13, %v781_v12 }
 0x241   :  { %859 = vmatmul.mubr.f32.vlgmr.msra.gmra.mrb[4].mxu0 %v786_v16  ;;  %930 = vmatmul.mubr.f32.vlgmr.msra.gmra.mrb[4].mxu1 %v786_v16 }
 0x242   :  { %2207 = vmatpush1.bf16.msra.mxu0 %v2876_v22  ;;  %2239 = vmatpush1.bf16.msra.mxu1 %v2879_v25 }
 0x243   :  { %2209 = vmatprep.subr.bf16.mxu0 %v2883_v29  ;;  %2241 = vmatprep.subr.bf16.mxu1 %v2890_v34 }
 0x244   :  { %1029 = vmatprep.mubr.f32.mxu0 %v2780_v0  ;;  %1100 = vmatprep.mubr.f32.mxu1 %v2780_v0 }
 0x246   :  { %2211 = vmatpush1.bf16.msra.mxu0 %v2892_v35  ;;  %2243 = vmatpush1.bf16.msra.mxu1 %v2896_v38 }
 0x247   :  { %2213 = vmatprep.subr.bf16.mxu0 %v2900_v42  ;;  %2245 = vmatprep.subr.bf16.mxu1 %v2907_v47 }
 0x24a   :  { %2215 = vmatpush1.bf16.msra.mxu0 %v2911_v50  ;;  %2247 = vmatpush1.bf16.msra.mxu1 %v2915_v54 }
 0x24b   :  { %2217 = vmatprep.subr.bf16.mxu0 %v2919_v58  ;;  %2249 = vmatprep.subr.bf16.mxu1 %v2923_v61 }
 0x24e   :  { %2219 = vmatpush1.bf16.msra.mxu0 %v2930_v2  ;;  %2251 = vmatpush1.bf16.msra.mxu1 %v2934_v5 }
 0x24f   :  { %2221 = vmatprep.subr.bf16.mxu0 %v2938_v8  ;;  %2253 = vmatprep.subr.bf16.mxu1 %v2942_v11 }
 0x252   :  { %2223 = vmatpush1.bf16.msra.mxu0 %v2949_v15  ;;  %2255 = vmatpush1.bf16.msra.mxu1 %v2953_v19 }
 0x253   :  { %2225 = vmatprep.subr.bf16.mxu0 %v2957_v24  ;;  %2257 = vmatprep.subr.bf16.mxu1 %v2961_v28 }
 0x256   :  { %2227 = vmatpush1.bf16.msra.mxu0 %v2968_v33  ;;  %2259 = vmatpush1.bf16.msra.mxu1 %v2972_v39 }
 0x257   :  { %2229 = vmatprep.subr.bf16.mxu0 %v2976_v43  ;;  %2261 = vmatprep.subr.bf16.mxu1 %v2980_v46 }
 0x25a   :  { %2231 = vmatpush1.bf16.msra.mxu0 %v2987_v52  ;;  %2263 = vmatpush1.bf16.msra.mxu1 %v2991_v56 }
 0x25b   :  { %2233 = vmatprep.subr.bf16.mxu0 %v2995_v60  ;;  %2265 = vmatprep.subr.bf16.mxu1 %v2999_v1 }
 0x25e   :  { %2235 = vmatpush1.bf16.msra.mxu0 %v3006_v4  ;;  %2267 = vmatpush1.bf16.msra.mxu1 %v3010_v6 }
 0x25f   :  { %2269 = vmatprep.subr.bf16.mxu0 %v2872_v17  ;;  %2301 = vmatprep.subr.bf16.mxu1 %v2874_v21 }
 0x314   :  { %v860_v7 = vpop.f32.mrb[4].mxu0  ;;  %v931_v20 = vpop.f32.mrb[4].mxu1 }
 0x315   :  { %v2552_v23 = vadd.f32 %v860_v7, %v3062_v14  ;;  %v862_v27 = vpop.f32.mrb[5].mxu0  ;;  %v933_v30 = vpop.f32.mrb[5].mxu1  ;;  %v2568_v37 = vadd.f32 %v931_v20, %v3067_v26 }
 0x316   :  { %v2553_v31 = vadd.f32 %v862_v27, %v3064_v18  ;;  %v2569_v40 = vadd.f32 %v933_v30, %v3071_v44 }
 0x317   :  { %v940_v32 = vmul.f32 0.5, %v2552_v23 }
 0x318   :  { %v944_v36 = vmul.f32 0.5, %v2553_v31  ;;  %v949_v41 = vmul.f32 0.5, %v2569_v40 }
 0x319   :  { %2642 = vtanh.f32 %v940_v32 }
 0x31a   :  { %2644 = vtanh.f32 %v944_v36 }
 0x31b   :  { %2646 = vtanh.f32 %v2568_v37 }
 0x31c   :  { %2648 = vtanh.f32 %v949_v41 }
 0x323   :  { %v2643_v45 = vpop.eup %2642 }
 0x324   :  { %v2645_v48 = vpop.eup %2644  ;;  %v942_v49 = vmul.f32 0.5, %v2643_v45 }
 0x325   :  { %v946_v51 = vmul.f32 0.5, %v2645_v48  ;;  %v2647_v55 = vpop.eup %2646 }
 0x326   :  { %v943_v53 = vadd.f32 0.5, %v942_v49  ;;  %v2649_v9 = vpop.eup %2648 }
 0x327   :  { %v947_v57 = vadd.f32 0.5, %v946_v51  ;;  %v951_v10 = vmul.f32 0.5, %v2649_v9 }
 0x328   :  { %v954_v59 = vmul.f32 %v2647_v55, %v943_v53 }
 0x329   :  { %v953_v62 = vmul.f32 %v947_v57, %v3116_v3  ;;  %v952_v12 = vadd.f32 0.5, %v951_v10 }
 0x32b   :  { %v3158_v63 = vadd.f32 %v954_v59, %v953_v62 }
 0x32d   :  { %2650 = vtanh.f32 %v3158_v63 }
 0x337   :  { %v2651_v13 = vpop.eup %2650 }
 0x338   :  { %v957_v16 = vmul.f32 %v2651_v13, %v952_v12 }
 0x33a   :  { %1030 = vmatmul.mubr.f32.vlgmr.msra.gmra.mrb[6].mxu0 %v957_v16  ;;  %1101 = vmatmul.mubr.f32.vlgmr.msra.gmra.mrb[6].mxu1 %v957_v16 }
 0x33b   :  { %2271 = vmatpush1.bf16.msra.mxu0 %v2876_v22  ;;  %2303 = vmatpush1.bf16.msra.mxu1 %v2879_v25 }
 0x33c   :  { %2273 = vmatprep.subr.bf16.mxu0 %v2883_v29  ;;  %2305 = vmatprep.subr.bf16.mxu1 %v2890_v34 }
 0x33d   :  { %1200 = vmatprep.mubr.f32.mxu0 %v2780_v0  ;;  %1271 = vmatprep.mubr.f32.mxu1 %v2780_v0 }
 0x33f   :  { %2275 = vmatpush1.bf16.msra.mxu0 %v2892_v35  ;;  %2307 = vmatpush1.bf16.msra.mxu1 %v2896_v38 }
 0x340   :  { %2277 = vmatprep.subr.bf16.mxu0 %v2900_v42  ;;  %2309 = vmatprep.subr.bf16.mxu1 %v2907_v47 }
 0x343   :  { %2279 = vmatpush1.bf16.msra.mxu0 %v2911_v50  ;;  %2311 = vmatpush1.bf16.msra.mxu1 %v2915_v54 }
 0x344   :  { %2281 = vmatprep.subr.bf16.mxu0 %v2919_v58  ;;  %2313 = vmatprep.subr.bf16.mxu1 %v2923_v61 }
 0x347   :  { %2283 = vmatpush1.bf16.msra.mxu0 %v2930_v2  ;;  %2315 = vmatpush1.bf16.msra.mxu1 %v2934_v5 }
 0x348   :  { %2285 = vmatprep.subr.bf16.mxu0 %v2938_v8  ;;  %2317 = vmatprep.subr.bf16.mxu1 %v2942_v11 }
 0x34b   :  { %2287 = vmatpush1.bf16.msra.mxu0 %v2949_v15  ;;  %2319 = vmatpush1.bf16.msra.mxu1 %v2953_v19 }
 0x34c   :  { %2289 = vmatprep.subr.bf16.mxu0 %v2957_v24  ;;  %2321 = vmatprep.subr.bf16.mxu1 %v2961_v28 }
 0x34f   :  { %2291 = vmatpush1.bf16.msra.mxu0 %v2968_v33  ;;  %2323 = vmatpush1.bf16.msra.mxu1 %v2972_v39 }
 0x350   :  { %2293 = vmatprep.subr.bf16.mxu0 %v2976_v43  ;;  %2325 = vmatprep.subr.bf16.mxu1 %v2980_v46 }
 0x353   :  { %2295 = vmatpush1.bf16.msra.mxu0 %v2987_v52  ;;  %2327 = vmatpush1.bf16.msra.mxu1 %v2991_v56 }
 0x354   :  { %2297 = vmatprep.subr.bf16.mxu0 %v2995_v60  ;;  %2329 = vmatprep.subr.bf16.mxu1 %v2999_v1 }
 0x357   :  { %2299 = vmatpush1.bf16.msra.mxu0 %v3006_v4  ;;  %2331 = vmatpush1.bf16.msra.mxu1 %v3010_v6 }
 0x358   :  { %2333 = vmatprep.subr.bf16.mxu0 %v2872_v17  ;;  %2365 = vmatprep.subr.bf16.mxu1 %v2874_v21 }
 0x40d   :  { %v1031_v3 = vpop.f32.mrb[6].mxu0  ;;  %v1102_v7 = vpop.f32.mrb[6].mxu1 }
 0x40e   :  { %v2554_v20 = vadd.f32 %v1031_v3, %v3062_v14  ;;  %v1033_v23 = vpop.f32.mrb[7].mxu0  ;;  %v1104_v27 = vpop.f32.mrb[7].mxu1  ;;  %v2570_v36 = vadd.f32 %v1102_v7, %v3067_v26 }
 0x40f   :  { %v2555_v30 = vadd.f32 %v1033_v23, %v3064_v18  ;;  %v2571_v37 = vadd.f32 %v1104_v27, %v3071_v44 }
 0x410   :  { %v1111_v31 = vmul.f32 0.5, %v2554_v20 }
 0x411   :  { %v1115_v32 = vmul.f32 0.5, %v2555_v30  ;;  %v1120_v40 = vmul.f32 0.5, %v2571_v37 }
 0x412   :  { %2652 = vtanh.f32 %v1111_v31 }
 0x413   :  { %2654 = vtanh.f32 %v1115_v32 }
 0x414   :  { %2656 = vtanh.f32 %v2570_v36 }
 0x415   :  { %2658 = vtanh.f32 %v1120_v40 }
 0x41c   :  { %v2653_v41 = vpop.eup %2652 }
 0x41d   :  { %v2655_v45 = vpop.eup %2654  ;;  %v1113_v48 = vmul.f32 0.5, %v2653_v41 }
 0x41e   :  { %v1117_v49 = vmul.f32 0.5, %v2655_v45  ;;  %v2657_v53 = vpop.eup %2656 }
 0x41f   :  { %v1114_v51 = vadd.f32 0.5, %v1113_v48  ;;  %v2659_v9 = vpop.eup %2658 }
 0x420   :  { %v1118_v55 = vadd.f32 0.5, %v1117_v49  ;;  %v1122_v10 = vmul.f32 0.5, %v2659_v9 }
 0x421   :  { %v1125_v57 = vmul.f32 %v2657_v53, %v1114_v51 }
 0x422   :  { %v1124_v59 = vmul.f32 %v1118_v55, %v3158_v63  ;;  %v1123_v12 = vadd.f32 0.5, %v1122_v10 }
 0x424   :  { %v3200_v62 = vadd.f32 %v1125_v57, %v1124_v59 }
 0x426   :  { %2660 = vtanh.f32 %v3200_v62 }
 0x430   :  { %v2661_v13 = vpop.eup %2660 }
 0x431   :  { %v1128_v16 = vmul.f32 %v2661_v13, %v1123_v12 }
 0x433   :  { %1201 = vmatmul.mubr.f32.vlgmr.msra.gmra.mrb[8].mxu0 %v1128_v16  ;;  %1272 = vmatmul.mubr.f32.vlgmr.msra.gmra.mrb[8].mxu1 %v1128_v16 }
 0x434   :  { %2335 = vmatpush1.bf16.msra.mxu0 %v2876_v22  ;;  %2367 = vmatpush1.bf16.msra.mxu1 %v2879_v25 }
 0x435   :  { %2337 = vmatprep.subr.bf16.mxu0 %v2883_v29  ;;  %2369 = vmatprep.subr.bf16.mxu1 %v2890_v34 }
 0x436   :  { %1371 = vmatprep.mubr.f32.mxu0 %v2780_v0  ;;  %1442 = vmatprep.mubr.f32.mxu1 %v2780_v0 }
 0x438   :  { %2339 = vmatpush1.bf16.msra.mxu0 %v2892_v35  ;;  %2371 = vmatpush1.bf16.msra.mxu1 %v2896_v38 }
 0x439   :  { %2341 = vmatprep.subr.bf16.mxu0 %v2900_v42  ;;  %2373 = vmatprep.subr.bf16.mxu1 %v2907_v47 }
 0x43c   :  { %2343 = vmatpush1.bf16.msra.mxu0 %v2911_v50  ;;  %2375 = vmatpush1.bf16.msra.mxu1 %v2915_v54 }
 0x43d   :  { %2345 = vmatprep.subr.bf16.mxu0 %v2919_v58  ;;  %2377 = vmatprep.subr.bf16.mxu1 %v2923_v61 }
 0x440   :  { %2347 = vmatpush1.bf16.msra.mxu0 %v2930_v2  ;;  %2379 = vmatpush1.bf16.msra.mxu1 %v2934_v5 }
 0x441   :  { %2349 = vmatprep.subr.bf16.mxu0 %v2938_v8  ;;  %2381 = vmatprep.subr.bf16.mxu1 %v2942_v11 }
 0x444   :  { %2351 = vmatpush1.bf16.msra.mxu0 %v2949_v15  ;;  %2383 = vmatpush1.bf16.msra.mxu1 %v2953_v19 }
 0x445   :  { %2353 = vmatprep.subr.bf16.mxu0 %v2957_v24  ;;  %2385 = vmatprep.subr.bf16.mxu1 %v2961_v28 }
 0x448   :  { %2355 = vmatpush1.bf16.msra.mxu0 %v2968_v33  ;;  %2387 = vmatpush1.bf16.msra.mxu1 %v2972_v39 }
 0x449   :  { %2357 = vmatprep.subr.bf16.mxu0 %v2976_v43  ;;  %2389 = vmatprep.subr.bf16.mxu1 %v2980_v46 }
 0x44c   :  { %2359 = vmatpush1.bf16.msra.mxu0 %v2987_v52  ;;  %2391 = vmatpush1.bf16.msra.mxu1 %v2991_v56 }
 0x44d   :  { %2361 = vmatprep.subr.bf16.mxu0 %v2995_v60  ;;  %2393 = vmatprep.subr.bf16.mxu1 %v2999_v1 }
 0x450   :  { %2363 = vmatpush1.bf16.msra.mxu0 %v3006_v4  ;;  %2395 = vmatpush1.bf16.msra.mxu1 %v3010_v6 }
 0x451   :  { %2397 = vmatprep.subr.bf16.mxu0 %v2872_v17  ;;  %2429 = vmatprep.subr.bf16.mxu1 %v2874_v21 }
 0x506   :  { %v1202_v63 = vpop.f32.mrb[8].mxu0  ;;  %v1273_v3 = vpop.f32.mrb[8].mxu1 }
 0x507   :  { %v2556_v7 = vadd.f32 %v1202_v63, %v3062_v14  ;;  %v1204_v20 = vpop.f32.mrb[9].mxu0  ;;  %v1275_v23 = vpop.f32.mrb[9].mxu1  ;;  %v2572_v32 = vadd.f32 %v1273_v3, %v3067_v26 }
 0x508   :  { %v2557_v27 = vadd.f32 %v1204_v20, %v3064_v18  ;;  %v2573_v36 = vadd.f32 %v1275_v23, %v3071_v44 }
 0x509   :  { %v1282_v30 = vmul.f32 0.5, %v2556_v7 }
 0x50a   :  { %v1286_v31 = vmul.f32 0.5, %v2557_v27  ;;  %v1291_v37 = vmul.f32 0.5, %v2573_v36 }
 0x50b   :  { %2662 = vtanh.f32 %v1282_v30 }
 0x50c   :  { %2664 = vtanh.f32 %v1286_v31 }
 0x50d   :  { %2666 = vtanh.f32 %v2572_v32 }
 0x50e   :  { %2668 = vtanh.f32 %v1291_v37 }
 0x515   :  { %v2663_v40 = vpop.eup %2662 }
 0x516   :  { %v2665_v41 = vpop.eup %2664  ;;  %v1284_v45 = vmul.f32 0.5, %v2663_v40 }
 0x517   :  { %v1288_v48 = vmul.f32 0.5, %v2665_v41  ;;  %v2667_v51 = vpop.eup %2666 }
 0x518   :  { %v1285_v49 = vadd.f32 0.5, %v1284_v45  ;;  %v2669_v9 = vpop.eup %2668 }
 0x519   :  { %v1289_v53 = vadd.f32 0.5, %v1288_v48  ;;  %v1293_v10 = vmul.f32 0.5, %v2669_v9 }
 0x51a   :  { %v1296_v55 = vmul.f32 %v2667_v51, %v1285_v49 }
 0x51b   :  { %v1295_v57 = vmul.f32 %v1289_v53, %v3200_v62  ;;  %v1294_v12 = vadd.f32 0.5, %v1293_v10 }
 0x51d   :  { %v3242_v59 = vadd.f32 %v1296_v55, %v1295_v57 }
 0x51f   :  { %2670 = vtanh.f32 %v3242_v59 }
 0x529   :  { %v2671_v13 = vpop.eup %2670 }
 0x52a   :  { %v1299_v16 = vmul.f32 %v2671_v13, %v1294_v12  ;;  %v1821_v13 = vld [vmem:[#allocation8 + $0x18] sm:$0xff] }
 0x52c   :  { %1372 = vmatmul.mubr.f32.vlgmr.msra.gmra.mrb[10].mxu0 %v1299_v16  ;;  %1443 = vmatmul.mubr.f32.vlgmr.msra.gmra.mrb[10].mxu1 %v1299_v16 }
 0x52d   :  { %2399 = vmatpush1.bf16.msra.mxu0 %v2876_v22  ;;  %2431 = vmatpush1.bf16.msra.mxu1 %v2879_v25 }
 0x52e   :  { %2401 = vmatprep.subr.bf16.mxu0 %v2883_v29  ;;  %2433 = vmatprep.subr.bf16.mxu1 %v2890_v34 }
 0x52f   :  { %1542 = vmatprep.mubr.f32.mxu0 %v2780_v0  ;;  %1613 = vmatprep.mubr.f32.mxu1 %v2780_v0 }
 0x531   :  { %2403 = vmatpush1.bf16.msra.mxu0 %v2892_v35  ;;  %2435 = vmatpush1.bf16.msra.mxu1 %v2896_v38 }
 0x532   :  { %2405 = vmatprep.subr.bf16.mxu0 %v2900_v42  ;;  %2437 = vmatprep.subr.bf16.mxu1 %v2907_v47 }
 0x535   :  { %2407 = vmatpush1.bf16.msra.mxu0 %v2911_v50  ;;  %2439 = vmatpush1.bf16.msra.mxu1 %v2915_v54 }
 0x536   :  { %2409 = vmatprep.subr.bf16.mxu0 %v2919_v58  ;;  %2441 = vmatprep.subr.bf16.mxu1 %v2923_v61 }
 0x539   :  { %2411 = vmatpush1.bf16.msra.mxu0 %v2930_v2  ;;  %2443 = vmatpush1.bf16.msra.mxu1 %v2934_v5 }
 0x53a   :  { %2413 = vmatprep.subr.bf16.mxu0 %v2938_v8  ;;  %2445 = vmatprep.subr.bf16.mxu1 %v2942_v11 }
 0x53d   :  { %2415 = vmatpush1.bf16.msra.mxu0 %v2949_v15  ;;  %2447 = vmatpush1.bf16.msra.mxu1 %v2953_v19 }
 0x53e   :  { %2417 = vmatprep.subr.bf16.mxu0 %v2957_v24  ;;  %2449 = vmatprep.subr.bf16.mxu1 %v2961_v28 }
 0x541   :  { %2419 = vmatpush1.bf16.msra.mxu0 %v2968_v33  ;;  %2451 = vmatpush1.bf16.msra.mxu1 %v2972_v39 }
 0x542   :  { %2421 = vmatprep.subr.bf16.mxu0 %v2976_v43  ;;  %2453 = vmatprep.subr.bf16.mxu1 %v2980_v46 }
 0x545   :  { %2423 = vmatpush1.bf16.msra.mxu0 %v2987_v52  ;;  %2455 = vmatpush1.bf16.msra.mxu1 %v2991_v56 }
 0x546   :  { %2425 = vmatprep.subr.bf16.mxu0 %v2995_v60  ;;  %2457 = vmatprep.subr.bf16.mxu1 %v2999_v1 }
 0x549   :  { %2427 = vmatpush1.bf16.msra.mxu0 %v3006_v4  ;;  %2459 = vmatpush1.bf16.msra.mxu1 %v3010_v6 }
 0x54a   :  { %2461 = vmatprep.subr.bf16.mxu0 %v2872_v17  ;;  %2493 = vmatprep.subr.bf16.mxu1 %v2874_v21 }
 0x5ff   :  { %v1373_v62 = vpop.f32.mrb[10].mxu0  ;;  %v1444_v63 = vpop.f32.mrb[10].mxu1 }
 0x600   :  { %v2558_v3 = vadd.f32 %v1373_v62, %v3062_v14  ;;  %v1375_v7 = vpop.f32.mrb[11].mxu0  ;;  %v1446_v20 = vpop.f32.mrb[11].mxu1  ;;  %v2574_v31 = vadd.f32 %v1444_v63, %v3067_v26  ;;  %v1822_v62 = vld [vmem:[#allocation8 + $0x20] sm:$0xff]  ;;  %v1823_v63 = vld [vmem:[#allocation8 + $0x28] sm:$0xff] }
 0x601   :  { %v2559_v23 = vadd.f32 %v1375_v7, %v3064_v18  ;;  %v2575_v32 = vadd.f32 %v1446_v20, %v3071_v44  ;;  %v1824_v7 = vld [vmem:[#allocation8 + $0x30] sm:$0xff]  ;;  %v1825_v20 = vld [vmem:[#allocation8 + $0x38] sm:$0xff] }
 0x602   :  { %v1453_v27 = vmul.f32 0.5, %v2558_v3  ;;  %v2531_v3 = vpack.c.bf16 %v1823_v63, %v1822_v62 }
 0x603   :  { %v1457_v30 = vmul.f32 0.5, %v2559_v23  ;;  %v1462_v17 = vmul.f32 0.5, %v2575_v32  ;;  %v2534_v23 = vpack.c.bf16 %v1825_v20, %v1824_v7  ;;  %v1828_v32 = vld [vmem:[#allocation8 + $0x50] sm:$0xff] }
 0x604   :  { %2672 = vtanh.f32 %v1453_v27  ;;  %v1826_v27 = vld [vmem:[#allocation8 + $0x40] sm:$0xff] }
 0x605   :  { %2674 = vtanh.f32 %v1457_v30  ;;  %v1827_v30 = vld [vmem:[#allocation8 + $0x48] sm:$0xff] }
 0x606   :  { %2676 = vtanh.f32 %v2574_v31  ;;  %v2537_v31 = vpack.c.bf16 %v1827_v30, %v1826_v27 }
 0x607   :  { %2678 = vtanh.f32 %v1462_v17  ;;  %v1829_v17 = vld [vmem:[#allocation8 + $0x58] sm:$0xff] }
 0x60e   :  { %v2673_v36 = vpop.eup %2672 }
 0x60f   :  { %v2675_v21 = vpop.eup %2674  ;;  %v1455_v37 = vmul.f32 0.5, %v2673_v36  ;;  %v2540_v36 = vpack.c.bf16 %v1829_v17, %v1828_v32 }
 0x610   :  { %v1459_v40 = vmul.f32 0.5, %v2675_v21  ;;  %v2677_v45 = vpop.eup %2676  ;;  %v1830_v21 = vld [vmem:[#allocation8 + $0x60] sm:$0xff] }
 0x611   :  { %v1456_v41 = vadd.f32 0.5, %v1455_v37  ;;  %v2679_v55 = vpop.eup %2678  ;;  %v1831_v37 = vld [vmem:[#allocation8 + $0x68] sm:$0xff] }
 0x612   :  { %v1460_v48 = vadd.f32 0.5, %v1459_v40  ;;  %v1464_v57 = vmul.f32 0.5, %v2679_v55  ;;  %v2543_v40 = vpack.c.bf16 %v1831_v37, %v1830_v21 }
 0x613   :  { %v1467_v49 = vmul.f32 %v2677_v45, %v1456_v41  ;;  %v1832_v41 = vld [vmem:[#allocation8 + $0x70] sm:$0xff]  ;;  %v1833_v45 = vld [vmem:[#allocation8 + $0x78] sm:$0xff] }
 0x614   :  { %v1466_v51 = vmul.f32 %v1460_v48, %v3242_v59  ;;  %v1465_v9 = vadd.f32 0.5, %v1464_v57  ;;  %v1820_v59 = vld [vmem:[#allocation8 + $0x10] sm:$0xff]  ;;  %v2546_v48 = vpack.c.bf16 %v1833_v45, %v1832_v41 }
 0x615   :  { %v2528_v16 = vpack.c.bf16 %v1821_v13, %v1820_v59 }
 0x616   :  { %v3284_v53 = vadd.f32 %v1467_v49, %v1466_v51 }
 0x618   :  { %2680 = vtanh.f32 %v3284_v53 }
 0x622   :  { %v2681_v10 = vpop.eup %2680 }
 0x623   :  { %v1470_v12 = vmul.f32 %v2681_v10, %v1465_v9 }
 0x625   :  { %1543 = vmatmul.mubr.f32.vlgmr.msra.gmra.mrb[12].mxu0 %v1470_v12  ;;  %1614 = vmatmul.mubr.f32.vlgmr.msra.gmra.mrb[12].mxu1 %v1470_v12 }
 0x626   :  { %2463 = vmatpush1.bf16.msra.mxu0 %v2876_v22  ;;  %2495 = vmatpush1.bf16.msra.mxu1 %v2879_v25 }
 0x627   :  { %2465 = vmatprep.subr.bf16.mxu0 %v2883_v29  ;;  %2497 = vmatprep.subr.bf16.mxu1 %v2890_v34 }
 0x628   :  { %1713 = vmatprep.mubr.f32.mxu0 %v2780_v0  ;;  %1784 = vmatprep.mubr.f32.mxu1 %v2780_v0 }
 0x62a   :  { %2467 = vmatpush1.bf16.msra.mxu0 %v2892_v35  ;;  %2499 = vmatpush1.bf16.msra.mxu1 %v2896_v38 }
 0x62b   :  { %2469 = vmatprep.subr.bf16.mxu0 %v2900_v42  ;;  %2501 = vmatprep.subr.bf16.mxu1 %v2907_v47 }
 0x62e   :  { %2471 = vmatpush1.bf16.msra.mxu0 %v2911_v50  ;;  %2503 = vmatpush1.bf16.msra.mxu1 %v2915_v54 }
 0x62f   :  { %2473 = vmatprep.subr.bf16.mxu0 %v2919_v58  ;;  %2505 = vmatprep.subr.bf16.mxu1 %v2923_v61 }
 0x632   :  { %2475 = vmatpush1.bf16.msra.mxu0 %v2930_v2  ;;  %2507 = vmatpush1.bf16.msra.mxu1 %v2934_v5 }
 0x633   :  { %2477 = vmatprep.subr.bf16.mxu0 %v2938_v8  ;;  %2509 = vmatprep.subr.bf16.mxu1 %v2942_v11 }
 0x636   :  { %2479 = vmatpush1.bf16.msra.mxu0 %v2949_v15  ;;  %2511 = vmatpush1.bf16.msra.mxu1 %v2953_v19 }
 0x637   :  { %2481 = vmatprep.subr.bf16.mxu0 %v2957_v24  ;;  %2513 = vmatprep.subr.bf16.mxu1 %v2961_v28 }
 0x63a   :  { %2483 = vmatpush1.bf16.msra.mxu0 %v2968_v33  ;;  %2515 = vmatpush1.bf16.msra.mxu1 %v2972_v39 }
 0x63b   :  { %2485 = vmatprep.subr.bf16.mxu0 %v2976_v43  ;;  %2517 = vmatprep.subr.bf16.mxu1 %v2980_v46 }
 0x63e   :  { %2487 = vmatpush1.bf16.msra.mxu0 %v2987_v52  ;;  %2519 = vmatpush1.bf16.msra.mxu1 %v2991_v56 }
 0x63f   :  { %2489 = vmatprep.subr.bf16.mxu0 %v2995_v60  ;;  %2521 = vmatprep.subr.bf16.mxu1 %v2999_v1  ;;  %v1818_v60 = vld [vmem:[#allocation8] sm:$0xff]  ;;  %v1819_v1 = vld [vmem:[#allocation8 + $0x8] sm:$0xff] }
 0x642   :  { %2491 = vmatpush1.bf16.msra.mxu0 %v3006_v4  ;;  %2523 = vmatpush1.bf16.msra.mxu1 %v3010_v6  ;;  %v2525_v4 = vpack.c.bf16 %v1819_v1, %v1818_v60  ;;  %v2781_v6 = vmov 0.0|0.0  }
 0x643   :  { %2524 = vmatprep.subr.bf16.mxu0 %v2781_v6 }
 0x6f8   :  { %v1544_v22 = vpop.f32.mrb[12].mxu0  ;;  %v1615_v25 = vpop.f32.mrb[12].mxu1 }
 0x6f9   :  { %v2560_v29 = vadd.f32 %v1544_v22, %v3062_v14  ;;  %v1546_v34 = vpop.f32.mrb[13].mxu0  ;;  %v1617_v35 = vpop.f32.mrb[13].mxu1  ;;  %v2576_v50 = vadd.f32 %v1615_v25, %v3067_v26 }
 0x6fa   :  { %v2561_v38 = vadd.f32 %v1546_v34, %v3064_v18  ;;  %v2577_v54 = vadd.f32 %v1617_v35, %v3071_v44 }
 0x6fb   :  { %v1624_v42 = vmul.f32 0.5, %v2560_v29 }
 0x6fc   :  { %v1628_v47 = vmul.f32 0.5, %v2561_v38  ;;  %v1633_v58 = vmul.f32 0.5, %v2577_v54 }
 0x6fd   :  { %2682 = vtanh.f32 %v1624_v42 }
 0x6fe   :  { %2684 = vtanh.f32 %v1628_v47 }
 0x6ff   :  { %2686 = vtanh.f32 %v2576_v50 }
 0x700   :  { %2688 = vtanh.f32 %v1633_v58 }
 0x707   :  { %v2683_v61 = vpop.eup %2682 }
 0x708   :  { %v2685_v2 = vpop.eup %2684  ;;  %v1626_v5 = vmul.f32 0.5, %v2683_v61 }
 0x709   :  { %v1630_v8 = vmul.f32 0.5, %v2685_v2  ;;  %v2687_v15 = vpop.eup %2686 }
 0x70a   :  { %v1627_v11 = vadd.f32 0.5, %v1626_v5  ;;  %v2689_v39 = vpop.eup %2688 }
 0x70b   :  { %v1631_v19 = vadd.f32 0.5, %v1630_v8  ;;  %v1635_v43 = vmul.f32 0.5, %v2689_v39 }
 0x70c   :  { %v1638_v24 = vmul.f32 %v2687_v15, %v1627_v11 }
 0x70d   :  { %v1637_v28 = vmul.f32 %v1631_v19, %v3284_v53  ;;  %v1636_v46 = vadd.f32 0.5, %v1635_v43 }
 0x70f   :  { %v3324_v33 = vadd.f32 %v1638_v24, %v1637_v28 }
 0x711   :  { %2690 = vtanh.f32 %v3324_v33 }
 0x71b   :  { %v2691_v52 = vpop.eup %2690 }
 0x71c   :  { %v1641_v56 = vmul.f32 %v2691_v52, %v1636_v46 }
 0x71e   :  { %1714 = vmatmul.mubr.f32.vlgmr.msra.gmra.mrb[14].mxu0 %v1641_v56  ;;  %1785 = vmatmul.mubr.f32.vlgmr.msra.gmra.mrb[14].mxu1 %v1641_v56 }
 0x71f   :  { %2526 = vmatpush3.bf16.msra.mxu0 %v2525_v4  ;;  %2001 = vmatprep.mubr.msk.f32.mxu0 %vm2782_vm1, %v2780_v0 }
 0x720   :  { %2527 = vmatprep.subr.bf16.mxu0 %v2781_v6 }
 0x723   :  { %2529 = vmatpush3.bf16.msra.mxu0 %v2528_v16 }
 0x724   :  { %2530 = vmatprep.subr.bf16.mxu0 %v2781_v6 }
 0x727   :  { %2532 = vmatpush3.bf16.msra.mxu0 %v2531_v3 }
 0x728   :  { %2533 = vmatprep.subr.bf16.mxu0 %v2781_v6 }
 0x72b   :  { %2535 = vmatpush3.bf16.msra.mxu0 %v2534_v23 }
 0x72c   :  { %2536 = vmatprep.subr.bf16.mxu0 %v2781_v6 }
 0x72f   :  { %2538 = vmatpush3.bf16.msra.mxu0 %v2537_v31 }
 0x730   :  { %2539 = vmatprep.subr.bf16.mxu0 %v2781_v6 }
 0x733   :  { %2541 = vmatpush3.bf16.msra.mxu0 %v2540_v36 }
 0x734   :  { %2542 = vmatprep.subr.bf16.mxu0 %v2781_v6 }
 0x737   :  { %2544 = vmatpush3.bf16.msra.mxu0 %v2543_v40 }
 0x738   :  { %2545 = vmatprep.subr.bf16.mxu0 %v2781_v6 }
 0x73b   :  { %2547 = vmatpush3.bf16.msra.mxu0 %v2546_v48 }
 0x7f1   :  { %v1715_v49 = vpop.f32.mrb[14].mxu0  ;;  %v1786_v51 = vpop.f32.mrb[14].mxu1 }
 0x7f2   :  { %v2562_v53 = vadd.f32 %v1715_v49, %v3062_v14  ;;  %v1717_v55 = vpop.f32.mrb[15].mxu0  ;;  %v1788_v57 = vpop.f32.mrb[15].mxu1  ;;  %v2578_v22 = vadd.f32 %v1786_v51, %v3067_v26 }
 0x7f3   :  { %v2563_v9 = vadd.f32 %v1717_v55, %v3064_v18  ;;  %v2579_v25 = vadd.f32 %v1788_v57, %v3071_v44  ;;  %v1951_v44 = vld [vmem:[%s3353_s5] ss:$0 sm:$0xff] }
 0x7f4   :  { %v1795_v10 = vmul.f32 0.5, %v2562_v53 }
 0x7f5   :  { %v1799_v12 = vmul.f32 0.5, %v2563_v9  ;;  %v1804_v29 = vmul.f32 0.5, %v2579_v25 }
 0x7f6   :  { %2692 = vtanh.f32 %v1795_v10 }
 0x7f7   :  { %2694 = vtanh.f32 %v1799_v12 }
 0x7f8   :  { %2696 = vtanh.f32 %v2578_v22 }
 0x7f9   :  { %2698 = vtanh.f32 %v1804_v29 }
 0x800   :  { %v2693_v34 = vpop.eup %2692 }
 0x801   :  { %v2695_v0 = vpop.eup %2694  ;;  %v1797_v35 = vmul.f32 0.5, %v2693_v34 }
 0x802   :  { %v1801_v38 = vmul.f32 0.5, %v2695_v0  ;;  %v2697_v42 = vpop.eup %2696 }
 0x803   :  { %v1798_v14 = vadd.f32 0.5, %v1797_v35  ;;  %v2699_v58 = vpop.eup %2698 }
 0x804   :  { %v1802_v47 = vadd.f32 0.5, %v1801_v38  ;;  %v1806_v26 = vmul.f32 0.5, %v2699_v58 }
 0x805   :  { %v1809_v50 = vmul.f32 %v2697_v42, %v1798_v14 }
 0x806   :  { %v1808_v18 = vmul.f32 %v1802_v47, %v3324_v33  ;;  %v1807_v61 = vadd.f32 0.5, %v1806_v26 }
 0x808   :  { %v1810_v54 = vadd.f32 %v1809_v50, %v1808_v18 }
 0x80a   :  { %2700 = vtanh.f32 %v1810_v54 }
 0x814   :  { %v2701_v2 = vpop.eup %2700 }
 0x815   :  { %v1812_v5 = vmul.f32 %v2701_v2, %v1807_v61 }
 0x817   :  { %2002 = vmatmul.mubr.f32.vlgmr.msra.gmra.mrb[16].mxu0 %v1812_v5 }
 0x8ea   :  { %v1907_v8 = vpop.f32.mrb[16].mxu0 }
 0x8eb   :  { %v1908_v11 = vadd.f32 %v1951_v44, %v1907_v8  ;;  %v2003_v15 = vpop.f32.mrb[17].mxu0 }
 0x8ed   :  { %1911 = vst [vmem:[#allocation10] sm:$0xff] %v1908_v11 }
 0x8ee   :  { %2757 = shalt.err (!%p2754_p6)
}
 0x8ef   :  { %s2758_s11 = scalar_lea.hbm %s3354_s6, 128 }
 0x8f0   :  { %p2759_p7 = scmp.ne.s32.totalorder %s3354_s6, %s2758_s11  ;;  %p2762_p8 = scmp.lt.u32.totalorder %s2758_s11, %s3354_s6 }
 0x8f2   :  { %p2764_p9 = pnand %p2762_p8, %p2759_p7 }
 0x8f4   :  { %2767 = shalt.err (!%p2764_p9)
}
 0x8f5   :  { %1921 = dma.vmem_to_hbm [thread:$0]  %s1919_s7, 128, %s3354_s6, [#allocation7]  }
 0x8f6   :  { %2772 = dma.done.wait [#allocation7], 128  }
 0x8f7   :  { %2773 = vsyncadd [#allocation7], 4294967168 }
 0x8f8   :  { %1925 = vsyncpa [#allocation6], 1 }
 0x8f9   :  { %1926 = vsyncpa [#allocation9], 1 }
 0x8fa   :  { %1927 = vsyncpa [#allocation7], 1 }

</bundles_post_ra>
